<compile_context>
chip_gen: v7x
topology: tpu7x:2x2x1
jax: 0.10.0
libtpu: 0.0.40
codegen_flags: <defaults>
</compile_context>

<pallas_src>
import math
import jax
import jax.numpy as jnp
from jax.experimental import pallas as pl
from jax.experimental.pallas import tpu as pltpu

# ----------------------- hyper-parameters (small, deterministic) -----------------------
B = 2            # batch
C_IN = 4         # input channels of src
L = 16           # input sequence length
K = 3            # Conv1d kernel size
D_MODEL = 32     # d_model
C_OUT = D_MODEL - 1          # conv out channels (forward() requires d_model - 1)
L_CONV = L - K + 1           # 14
POOL = 2
L_POOL = L_CONV // POOL      # 7
S = L_POOL + 1               # 8  (after prepending the CLS column)
BS = B * S                   # 16 (batch folded into sublanes)
N_HEAD = 4
D_HEAD = D_MODEL // N_HEAD   # 8
D_FF = 64
N_CLASS = 3
LN_EPS = 1e-6                # spec LayerNorm eps
NEG_INF = -1e30


def _layer_norm(t, w, b):
    """Spec LayerNorm: a_2 * (x - mean) / (std + eps) + b_2, std unbiased (torch .std())."""
    mu = jnp.mean(t, axis=-1, keepdims=True)
    d = t - mu
    var = jnp.sum(d * d, axis=-1, keepdims=True) * (1.0 / (D_MODEL - 1))
    return w * d / (jnp.sqrt(var) + LN_EPS) + b


# --------------------------- single fused forward-pass kernel --------------------------
def fused_forward_kernel(src_ref, wconv_ref, bconv_ref, psel_ref, pecls_ref, bias_ref,
                         wq_ref, bq_ref, wk_ref, bk_ref, wv_ref, bv_ref, wo_ref, bo_ref,
                         ln1w_ref, ln1b_ref, w1_ref, b1_ref, w2_ref, b2_ref,
                         ln2w_ref, ln2b_ref, wout_ref, bout_ref,
                         o_ref):
    f32 = jnp.float32
    wconv = wconv_ref[...]            # (K*C_IN, C_OUT)   im2col conv weight
    bconv = bconv_ref[...]            # (1, C_OUT)        lane-dense conv bias
    psel = psel_ref[...]              # (L_POOL, L_CONV-1) stride-2 row-selection matrix
    pecls = pecls_ref[...]            # (S, D_MODEL)      PE with CLS one-hot folded in

    # ---- stage 1: Conv1d + ReLU + MaxPool1d(2) + CLS/PE, output in (seq, d_model) ----
    blocks = []
    for b in range(B):                                                  # static, B = 2
        xb = src_ref[b]                                                 # (L, C_IN)
        # im2col: one matmul instead of a K-loop of tiny dots
        x2 = jnp.concatenate([xb[kk:kk + L_CONV, :] for kk in range(K)], axis=1)  # (14,12)
        yb = jnp.dot(x2, wconv, preferred_element_type=f32) + bconv               # (14,31)
        yb = jnp.maximum(yb, 0.0)                                                 # fused ReLU
        # MaxPool1d(2): adjacent-row max, then pick rows 0,2,...,12 via a tiny matmul
        ym = jnp.maximum(yb[:L_CONV - 1, :], yb[1:, :])                           # (13,31)
        pooled = jnp.dot(psel, ym, preferred_element_type=f32)                    # (7,31)
        # prepend CLS channel (lane 0) and CLS token (row 0), add positional encoding
        blk = jnp.concatenate([jnp.zeros((L_POOL, 1), f32), pooled], axis=1)      # (7,32)
        blk = jnp.concatenate([jnp.zeros((1, D_MODEL), f32), blk], axis=0)        # (8,32)
        blocks.append(blk + pecls)
    x = jnp.concatenate(blocks, axis=0)                                 # (B*S, D_MODEL)

    # ---- stage 2: spec EncoderLayer (pre-norm sublayers), batch folded into sublanes ----
    # sublayer[0]:  x = x + self_attn(norm(x), norm(x), norm(x))
    xa = _layer_norm(x, ln1w_ref[...], ln1b_ref[...])
    q = jnp.dot(xa, wq_ref[...], preferred_element_type=f32) + bq_ref[...]
    k = jnp.dot(xa, wk_ref[...], preferred_element_type=f32) + bk_ref[...]
    v = jnp.dot(xa, wv_ref[...], preferred_element_type=f32) + bv_ref[...]

    # head split via static lane slices + stack (no lane-splitting reshape)
    qh = jnp.stack([q[:, h * D_HEAD:(h + 1) * D_HEAD] for h in range(N_HEAD)], axis=0)
    kh = jnp.stack([k[:, h * D_HEAD:(h + 1) * D_HEAD] for h in range(N_HEAD)], axis=0)
    vh = jnp.stack([v[:, h * D_HEAD:(h + 1) * D_HEAD] for h in range(N_HEAD)], axis=0)

    s = jnp.einsum('hqd,hkd->hqk', qh, kh, preferred_element_type=f32)  # (H, BS, BS)
    s = s * (1.0 / math.sqrt(D_HEAD)) + bias_ref[...]   # block-diag bias: no cross-batch attn
    s = s - jnp.max(s, axis=-1, keepdims=True)
    p = jnp.exp(s)
    p = p * pl.reciprocal(jnp.sum(p, axis=-1, keepdims=True), approx=True)
    ctx = jnp.einsum('hqk,hkd->hqd', p, vh, preferred_element_type=f32)  # (H, BS, D_HEAD)

    # output projection: per-head accumulation into Wo (no concat of heads)
    wo = wo_ref[...]
    attn = jnp.zeros((BS, D_MODEL), f32)
    for h in range(N_HEAD):
        attn = attn + jnp.dot(ctx[h], wo[h * D_HEAD:(h + 1) * D_HEAD, :],
                              preferred_element_type=f32)
    x = x + attn + bo_ref[...]                           # residual (dropout = identity)

    # sublayer[1]:  x = x + feed_forward(norm(x))   (Linear -> ReLU -> Linear)
    xf = _layer_norm(x, ln2w_ref[...], ln2b_ref[...])
    ff = jnp.maximum(jnp.dot(xf, w1_ref[...], preferred_element_type=f32) + b1_ref[...], 0.0)
    ff = jnp.dot(ff, w2_ref[...], preferred_element_type=f32) + b2_ref[...]
    z = x + ff                                           # (BS, D_MODEL)

    # ---- stage 3: CLS head:  out_ffn(z[:, 0, :]) -------------------------------------
    cls = jnp.concatenate([z[b * S:b * S + 1, :] for b in range(B)], axis=0)  # (B, D_MODEL)
    o_ref[...] = jnp.dot(cls, wout_ref[...], preferred_element_type=f32) + bout_ref[...]


def fused_forward(src, p):
    inputs = [
        src,
        p["conv_w2"], p["conv_b"], p["pool_sel"], p["pe_cls"], p["attn_bias"],
        p["wq_t"], p["bq"], p["wk_t"], p["bk"], p["wv_t"], p["bv"], p["wo_t"], p["bo"],
        p["ln1_w"], p["ln1_b"], p["w1_t"], p["b1"], p["w2_t"], p["b2"],
        p["ln2_w"], p["ln2_b"], p["wout_t"], p["bout"],
    ]

    def full_spec(a):
        nd = a.ndim
        return pl.BlockSpec(a.shape, lambda i, _nd=nd: (0,) * _nd)

    return pl.pallas_call(
        fused_forward_kernel,
        out_shape=jax.ShapeDtypeStruct((B, N_CLASS), jnp.float32),
        grid=(1,),                                   # single grid step: whole batch fused
        in_specs=[full_spec(a) for a in inputs],
        out_specs=pl.BlockSpec((B, N_CLASS), lambda i: (0, 0)),
        compiler_params=pltpu.CompilerParams(dimension_semantics=("arbitrary",)),
    )(*inputs)


# -------------------------------------- parameters -------------------------------------
def sinusoidal_pe(seq_len, d_model):
    pos = jnp.arange(seq_len, dtype=jnp.float32)[:, None]
    i = jnp.arange(0, d_model, 2, dtype=jnp.float32)[None, :]
    div = jnp.exp(-math.log(10000.0) * i / d_model)
    pe = jnp.zeros((seq_len, d_model), jnp.float32)
    pe = pe.at[:, 0::2].set(jnp.sin(pos * div))
    pe = pe.at[:, 1::2].set(jnp.cos(pos * div))
    return pe


def init_params(key):
    ks = jax.random.split(key, 16)

    def lin(k_, fan_in, shape):
        return jax.random.normal(k_, shape, jnp.float32) / math.sqrt(fan_in)

    conv_w = lin(ks[0], C_IN * K, (C_OUT, C_IN, K))       # torch Conv1d weight layout
    conv_b = lin(ks[1], C_IN * K, (C_OUT,)) * 0.1
    wq = lin(ks[2], D_MODEL, (D_MODEL, D_MODEL))
    wk = lin(ks[3], D_MODEL, (D_MODEL, D_MODEL))
    wv = lin(ks[4], D_MODEL, (D_MODEL, D_MODEL))
    wo = lin(ks[5], D_MODEL, (D_MODEL, D_MODEL))
    w1 = lin(ks[6], D_MODEL, (D_FF, D_MODEL)); b1 = lin(ks[7], D_MODEL, (D_FF,)) * 0.1
    w2 = lin(ks[8], D_FF, (D_MODEL, D_FF));    b2 = lin(ks[9], D_FF, (D_MODEL,)) * 0.1
    wout = lin(ks[10], D_MODEL, (N_CLASS, D_MODEL)); bout = lin(ks[11], D_MODEL, (N_CLASS,)) * 0.1

    # conv weight in im2col layout: row index k*C_IN + ci, column co
    conv_w2 = jnp.transpose(conv_w, (2, 1, 0)).reshape(K * C_IN, C_OUT)

    # stride-2 row-selection matrix for the fused MaxPool1d(2)
    pool_sel = jnp.zeros((L_POOL, L_CONV - 1), jnp.float32)
    pool_sel = pool_sel.at[jnp.arange(L_POOL), 2 * jnp.arange(L_POOL)].set(1.0)

    # sinusoidal PE with the CLS one-hot (value 1 at [seq 0, channel 0]) folded in
    pe_cls = sinusoidal_pe(S, D_MODEL).at[0, 0].add(1.0)

    # block-diagonal attention bias: tokens only attend within their own batch element
    rows = jnp.arange(BS, dtype=jnp.int32) // S
    attn_bias = jnp.where(rows[:, None] == rows[None, :], 0.0, NEG_INF).astype(jnp.float32)

    return {
        "conv_w2": conv_w2,
        "conv_b": conv_b.reshape(1, C_OUT),               # lane-dense conv bias
        "pool_sel": pool_sel,
        "pe_cls": pe_cls,
        "attn_bias": attn_bias,
        "wq_t": wq.T, "bq": jnp.zeros((1, D_MODEL), jnp.float32),
        "wk_t": wk.T, "bk": jnp.zeros((1, D_MODEL), jnp.float32),
        "wv_t": wv.T, "bv": jnp.zeros((1, D_MODEL), jnp.float32),
        "wo_t": wo.T, "bo": jnp.zeros((1, D_MODEL), jnp.float32),
        "ln1_w": jnp.ones((1, D_MODEL), jnp.float32), "ln1_b": jnp.zeros((1, D_MODEL), jnp.float32),
        "w1_t": w1.T, "b1": b1.reshape(1, -1),
        "w2_t": w2.T, "b2": b2.reshape(1, -1),
        "ln2_w": jnp.ones((1, D_MODEL), jnp.float32), "ln2_b": jnp.zeros((1, D_MODEL), jnp.float32),
        "wout_t": wout.T, "bout": bout.reshape(1, -1),
    }


# --------------------------------------- forward ---------------------------------------
@jax.jit
def forward(src, params):
    # src: (B, L, C_IN); the whole forward pass is one fused Pallas kernel — no XLA glue.
    return fused_forward(src, params)                     # (B, N_CLASS)


if __name__ == "__main__":
    key = jax.random.PRNGKey(0)
    k_param, k_src = jax.random.split(key)
    params = init_params(k_param)
    src = jax.random.normal(k_src, (B, L, C_IN), jnp.float32)

    logits = forward(src, params)
    jax.block_until_ready(logits)
    assert logits.shape == (B, N_CLASS)
    assert bool(jnp.all(jnp.isfinite(logits)))
    print("KERNEL_OK")
</pallas_src>

<mosaic_0001>
module attributes {stable_mosaic.version = 11 : i64} {
  func.func @fused_forward_kernel(%arg0: i32, %arg1: memref<2x16x4xf32, #tpu.memory_space<vmem>>, %arg2: memref<12x31xf32, #tpu.memory_space<vmem>>, %arg3: memref<1x31xf32, #tpu.memory_space<vmem>>, %arg4: memref<7x13xf32, #tpu.memory_space<vmem>>, %arg5: memref<8x32xf32, #tpu.memory_space<vmem>>, %arg6: memref<16x16xf32, #tpu.memory_space<vmem>>, %arg7: memref<32x32xf32, #tpu.memory_space<vmem>>, %arg8: memref<1x32xf32, #tpu.memory_space<vmem>>, %arg9: memref<32x32xf32, #tpu.memory_space<vmem>>, %arg10: memref<1x32xf32, #tpu.memory_space<vmem>>, %arg11: memref<32x32xf32, #tpu.memory_space<vmem>>, %arg12: memref<1x32xf32, #tpu.memory_space<vmem>>, %arg13: memref<32x32xf32, #tpu.memory_space<vmem>>, %arg14: memref<1x32xf32, #tpu.memory_space<vmem>>, %arg15: memref<1x32xf32, #tpu.memory_space<vmem>>, %arg16: memref<1x32xf32, #tpu.memory_space<vmem>>, %arg17: memref<32x64xf32, #tpu.memory_space<vmem>>, %arg18: memref<1x64xf32, #tpu.memory_space<vmem>>, %arg19: memref<64x32xf32, #tpu.memory_space<vmem>>, %arg20: memref<1x32xf32, #tpu.memory_space<vmem>>, %arg21: memref<1x32xf32, #tpu.memory_space<vmem>>, %arg22: memref<1x32xf32, #tpu.memory_space<vmem>>, %arg23: memref<32x3xf32, #tpu.memory_space<vmem>>, %arg24: memref<1x3xf32, #tpu.memory_space<vmem>>, %arg25: memref<2x3xf32, #tpu.memory_space<vmem>>) attributes {dimension_semantics = [#tpu.dimension_semantics<arbitrary>], iteration_bounds = array<i64: 1>, scalar_prefetch = 0 : i64, scratch_operands = 0 : i64, tpu.core_type = #tpu.core_type<tc>, window_params = [{pipeline_mode = #tpu.pipeline_mode<synchronous>, transform_indices = @transform_0, window_bounds = array<i64: 2, 16, 4>}, {pipeline_mode = #tpu.pipeline_mode<synchronous>, transform_indices = @transform_1, window_bounds = array<i64: 12, 31>}, {pipeline_mode = #tpu.pipeline_mode<synchronous>, transform_indices = @transform_2, window_bounds = array<i64: 1, 31>}, {pipeline_mode = #tpu.pipeline_mode<synchronous>, transform_indices = @transform_3, window_bounds = array<i64: 7, 13>}, {pipeline_mode = #tpu.pipeline_mode<synchronous>, transform_indices = @transform_4, window_bounds = array<i64: 8, 32>}, {pipeline_mode = #tpu.pipeline_mode<synchronous>, transform_indices = @transform_5, window_bounds = array<i64: 16, 16>}, {pipeline_mode = #tpu.pipeline_mode<synchronous>, transform_indices = @transform_6, window_bounds = array<i64: 32, 32>}, {pipeline_mode = #tpu.pipeline_mode<synchronous>, transform_indices = @transform_7, window_bounds = array<i64: 1, 32>}, {pipeline_mode = #tpu.pipeline_mode<synchronous>, transform_indices = @transform_8, window_bounds = array<i64: 32, 32>}, {pipeline_mode = #tpu.pipeline_mode<synchronous>, transform_indices = @transform_9, window_bounds = array<i64: 1, 32>}, {pipeline_mode = #tpu.pipeline_mode<synchronous>, transform_indices = @transform_10, window_bounds = array<i64: 32, 32>}, {pipeline_mode = #tpu.pipeline_mode<synchronous>, transform_indices = @transform_11, window_bounds = array<i64: 1, 32>}, {pipeline_mode = #tpu.pipeline_mode<synchronous>, transform_indices = @transform_12, window_bounds = array<i64: 32, 32>}, {pipeline_mode = #tpu.pipeline_mode<synchronous>, transform_indices = @transform_13, window_bounds = array<i64: 1, 32>}, {pipeline_mode = #tpu.pipeline_mode<synchronous>, transform_indices = @transform_14, window_bounds = array<i64: 1, 32>}, {pipeline_mode = #tpu.pipeline_mode<synchronous>, transform_indices = @transform_15, window_bounds = array<i64: 1, 32>}, {pipeline_mode = #tpu.pipeline_mode<synchronous>, transform_indices = @transform_16, window_bounds = array<i64: 32, 64>}, {pipeline_mode = #tpu.pipeline_mode<synchronous>, transform_indices = @transform_17, window_bounds = array<i64: 1, 64>}, {pipeline_mode = #tpu.pipeline_mode<synchronous>, transform_indices = @transform_18, window_bounds = array<i64: 64, 32>}, {pipeline_mode = #tpu.pipeline_mode<synchronous>, transform_indices = @transform_19, window_bounds = array<i64: 1, 32>}, {pipeline_mode = #tpu.pipeline_mode<synchronous>, transform_indices = @transform_20, window_bounds = array<i64: 1, 32>}, {pipeline_mode = #tpu.pipeline_mode<synchronous>, transform_indices = @transform_21, window_bounds = array<i64: 1, 32>}, {pipeline_mode = #tpu.pipeline_mode<synchronous>, transform_indices = @transform_22, window_bounds = array<i64: 32, 3>}, {pipeline_mode = #tpu.pipeline_mode<synchronous>, transform_indices = @transform_23, window_bounds = array<i64: 1, 3>}, {pipeline_mode = #tpu.pipeline_mode<synchronous>, transform_indices = @transform_24, window_bounds = array<i64: 2, 3>}]} {
    %c0 = arith.constant 0 : index
    %c0_0 = arith.constant 0 : index
    %0 = vector.load %arg2[%c0, %c0_0] : memref<12x31xf32, #tpu.memory_space<vmem>>, vector<12x31xf32>
    %c0_1 = arith.constant 0 : index
    %c0_2 = arith.constant 0 : index
    %1 = vector.load %arg3[%c0_1, %c0_2] : memref<1x31xf32, #tpu.memory_space<vmem>>, vector<1x31xf32>
    %c0_3 = arith.constant 0 : index
    %c0_4 = arith.constant 0 : index
    %2 = vector.load %arg4[%c0_3, %c0_4] : memref<7x13xf32, #tpu.memory_space<vmem>>, vector<7x13xf32>
    %c0_5 = arith.constant 0 : index
    %c0_6 = arith.constant 0 : index
    %3 = vector.load %arg5[%c0_5, %c0_6] : memref<8x32xf32, #tpu.memory_space<vmem>>, vector<8x32xf32>
    %c0_7 = arith.constant 0 : index
    %c0_8 = arith.constant 0 : index
    %c0_9 = arith.constant 0 : index
    %4 = vector.load %arg1[%c0_7, %c0_8, %c0_9] : memref<2x16x4xf32, #tpu.memory_space<vmem>>, vector<1x16x4xf32>
    %5 = vector.shape_cast %4 : vector<1x16x4xf32> to vector<16x4xf32>
    %6 = vector.extract_strided_slice %5 {offsets = [0, 0], sizes = [14, 4], strides = [1, 1]} : vector<16x4xf32> to vector<14x4xf32>
    %7 = vector.extract_strided_slice %5 {offsets = [1, 0], sizes = [14, 4], strides = [1, 1]} : vector<16x4xf32> to vector<14x4xf32>
    %8 = vector.extract_strided_slice %5 {offsets = [2, 0], sizes = [14, 4], strides = [1, 1]} : vector<16x4xf32> to vector<14x4xf32>
    %9 = tpu.concatenate %6, %7, %8 in 1 : vector<14x4xf32>, vector<14x4xf32>, vector<14x4xf32> -> vector<14x12xf32>
    %cst = arith.constant dense<0.000000e+00> : vector<14x31xf32>
    %10 = tpu.matmul %9, %0, %cst {dimension_numbers = #tpu.dot_dimension_numbers<[1], [0], [0], [1], [0, 0, 1, 1], [], []>} : vector<14x12xf32>, vector<12x31xf32>, vector<14x31xf32> -> vector<14x31xf32>
    %11 = vector.broadcast %1 : vector<1x31xf32> to vector<14x31xf32>
    %12 = arith.addf %10, %11 : vector<14x31xf32>
    %cst_10 = arith.constant 0.000000e+00 : f32
    %13 = vector.broadcast %cst_10 : f32 to vector<14x31xf32>
    %14 = arith.maximumf %12, %13 : vector<14x31xf32>
    %15 = vector.extract_strided_slice %14 {offsets = [0, 0], sizes = [13, 31], strides = [1, 1]} : vector<14x31xf32> to vector<13x31xf32>
    %16 = vector.extract_strided_slice %14 {offsets = [1, 0], sizes = [13, 31], strides = [1, 1]} : vector<14x31xf32> to vector<13x31xf32>
    %17 = arith.maximumf %15, %16 : vector<13x31xf32>
    %cst_11 = arith.constant dense<0.000000e+00> : vector<7x31xf32>
    %18 = tpu.matmul %2, %17, %cst_11 {dimension_numbers = #tpu.dot_dimension_numbers<[1], [0], [0], [1], [0, 0, 1, 1], [], []>} : vector<7x13xf32>, vector<13x31xf32>, vector<7x31xf32> -> vector<7x31xf32>
    %cst_12 = arith.constant 0.000000e+00 : f32
    %19 = vector.broadcast %cst_12 : f32 to vector<7x1xf32>
    %20 = tpu.concatenate %19, %18 in 1 : vector<7x1xf32>, vector<7x31xf32> -> vector<7x32xf32>
    %cst_13 = arith.constant 0.000000e+00 : f32
    %21 = vector.broadcast %cst_13 : f32 to vector<1x32xf32>
    %22 = tpu.concatenate %21, %20 in 0 : vector<1x32xf32>, vector<7x32xf32> -> vector<8x32xf32>
    %23 = arith.addf %22, %3 : vector<8x32xf32>
    %c1 = arith.constant 1 : index
    %c0_14 = arith.constant 0 : index
    %c0_15 = arith.constant 0 : index
    %24 = vector.load %arg1[%c1, %c0_14, %c0_15] : memref<2x16x4xf32, #tpu.memory_space<vmem>>, vector<1x16x4xf32>
    %25 = vector.shape_cast %24 : vector<1x16x4xf32> to vector<16x4xf32>
    %26 = vector.extract_strided_slice %25 {offsets = [0, 0], sizes = [14, 4], strides = [1, 1]} : vector<16x4xf32> to vector<14x4xf32>
    %27 = vector.extract_strided_slice %25 {offsets = [1, 0], sizes = [14, 4], strides = [1, 1]} : vector<16x4xf32> to vector<14x4xf32>
    %28 = vector.extract_strided_slice %25 {offsets = [2, 0], sizes = [14, 4], strides = [1, 1]} : vector<16x4xf32> to vector<14x4xf32>
    %29 = tpu.concatenate %26, %27, %28 in 1 : vector<14x4xf32>, vector<14x4xf32>, vector<14x4xf32> -> vector<14x12xf32>
    %cst_16 = arith.constant dense<0.000000e+00> : vector<14x31xf32>
    %30 = tpu.matmul %29, %0, %cst_16 {dimension_numbers = #tpu.dot_dimension_numbers<[1], [0], [0], [1], [0, 0, 1, 1], [], []>} : vector<14x12xf32>, vector<12x31xf32>, vector<14x31xf32> -> vector<14x31xf32>
    %31 = vector.broadcast %1 : vector<1x31xf32> to vector<14x31xf32>
    %32 = arith.addf %30, %31 : vector<14x31xf32>
    %cst_17 = arith.constant 0.000000e+00 : f32
    %33 = vector.broadcast %cst_17 : f32 to vector<14x31xf32>
    %34 = arith.maximumf %32, %33 : vector<14x31xf32>
    %35 = vector.extract_strided_slice %34 {offsets = [0, 0], sizes = [13, 31], strides = [1, 1]} : vector<14x31xf32> to vector<13x31xf32>
    %36 = vector.extract_strided_slice %34 {offsets = [1, 0], sizes = [13, 31], strides = [1, 1]} : vector<14x31xf32> to vector<13x31xf32>
    %37 = arith.maximumf %35, %36 : vector<13x31xf32>
    %cst_18 = arith.constant dense<0.000000e+00> : vector<7x31xf32>
    %38 = tpu.matmul %2, %37, %cst_18 {dimension_numbers = #tpu.dot_dimension_numbers<[1], [0], [0], [1], [0, 0, 1, 1], [], []>} : vector<7x13xf32>, vector<13x31xf32>, vector<7x31xf32> -> vector<7x31xf32>
    %cst_19 = arith.constant 0.000000e+00 : f32
    %39 = vector.broadcast %cst_19 : f32 to vector<7x1xf32>
    %40 = tpu.concatenate %39, %38 in 1 : vector<7x1xf32>, vector<7x31xf32> -> vector<7x32xf32>
    %cst_20 = arith.constant 0.000000e+00 : f32
    %41 = vector.broadcast %cst_20 : f32 to vector<1x32xf32>
    %42 = tpu.concatenate %41, %40 in 0 : vector<1x32xf32>, vector<7x32xf32> -> vector<8x32xf32>
    %43 = arith.addf %42, %3 : vector<8x32xf32>
    %44 = tpu.concatenate %23, %43 in 0 : vector<8x32xf32>, vector<8x32xf32> -> vector<16x32xf32>
    %c0_21 = arith.constant 0 : index
    %c0_22 = arith.constant 0 : index
    %45 = vector.load %arg15[%c0_21, %c0_22] : memref<1x32xf32, #tpu.memory_space<vmem>>, vector<1x32xf32>
    %c0_23 = arith.constant 0 : index
    %c0_24 = arith.constant 0 : index
    %46 = vector.load %arg16[%c0_23, %c0_24] : memref<1x32xf32, #tpu.memory_space<vmem>>, vector<1x32xf32>
    %cst_25 = arith.constant dense<0.000000e+00> : vector<16xf32>
    %47 = vector.multi_reduction <add>, %44, %cst_25 [1] : vector<16x32xf32> to vector<16xf32>
    %48 = vector.shape_cast %47 : vector<16xf32> to vector<16x1xf32>
    %cst_26 = arith.constant 3.200000e+01 : f32
    %49 = vector.broadcast %cst_26 : f32 to vector<16x1xf32>
    %50 = arith.divf %48, %49 : vector<16x1xf32>
    %51 = vector.broadcast %50 : vector<16x1xf32> to vector<16x32xf32>
    %52 = arith.subf %44, %51 : vector<16x32xf32>
    %53 = arith.mulf %52, %52 : vector<16x32xf32>
    %cst_27 = arith.constant dense<0.000000e+00> : vector<16xf32>
    %54 = vector.multi_reduction <add>, %53, %cst_27 [1] : vector<16x32xf32> to vector<16xf32>
    %55 = vector.shape_cast %54 : vector<16xf32> to vector<16x1xf32>
    %cst_28 = arith.constant 0.0322580636 : f32
    %56 = vector.broadcast %cst_28 : f32 to vector<16x1xf32>
    %57 = arith.mulf %55, %56 : vector<16x1xf32>
    %58 = vector.broadcast %45 : vector<1x32xf32> to vector<16x32xf32>
    %59 = arith.mulf %58, %52 : vector<16x32xf32>
    %60 = math.sqrt %57 : vector<16x1xf32>
    %cst_29 = arith.constant 9.99999997E-7 : f32
    %61 = vector.broadcast %cst_29 : f32 to vector<16x1xf32>
    %62 = arith.addf %60, %61 : vector<16x1xf32>
    %63 = vector.broadcast %62 : vector<16x1xf32> to vector<16x32xf32>
    %64 = arith.divf %59, %63 : vector<16x32xf32>
    %65 = vector.broadcast %46 : vector<1x32xf32> to vector<16x32xf32>
    %66 = arith.addf %64, %65 : vector<16x32xf32>
    %c0_30 = arith.constant 0 : index
    %c0_31 = arith.constant 0 : index
    %67 = vector.load %arg7[%c0_30, %c0_31] : memref<32x32xf32, #tpu.memory_space<vmem>>, vector<32x32xf32>
    %cst_32 = arith.constant dense<0.000000e+00> : vector<16x32xf32>
    %68 = tpu.matmul %66, %67, %cst_32 {dimension_numbers = #tpu.dot_dimension_numbers<[1], [0], [0], [1], [0, 0, 1, 1], [], []>} : vector<16x32xf32>, vector<32x32xf32>, vector<16x32xf32> -> vector<16x32xf32>
    %c0_33 = arith.constant 0 : index
    %c0_34 = arith.constant 0 : index
    %69 = vector.load %arg8[%c0_33, %c0_34] : memref<1x32xf32, #tpu.memory_space<vmem>>, vector<1x32xf32>
    %70 = vector.broadcast %69 : vector<1x32xf32> to vector<16x32xf32>
    %71 = arith.addf %68, %70 : vector<16x32xf32>
    %c0_35 = arith.constant 0 : index
    %c0_36 = arith.constant 0 : index
    %72 = vector.load %arg9[%c0_35, %c0_36] : memref<32x32xf32, #tpu.memory_space<vmem>>, vector<32x32xf32>
    %cst_37 = arith.constant dense<0.000000e+00> : vector<16x32xf32>
    %73 = tpu.matmul %66, %72, %cst_37 {dimension_numbers = #tpu.dot_dimension_numbers<[1], [0], [0], [1], [0, 0, 1, 1], [], []>} : vector<16x32xf32>, vector<32x32xf32>, vector<16x32xf32> -> vector<16x32xf32>
    %c0_38 = arith.constant 0 : index
    %c0_39 = arith.constant 0 : index
    %74 = vector.load %arg10[%c0_38, %c0_39] : memref<1x32xf32, #tpu.memory_space<vmem>>, vector<1x32xf32>
    %75 = vector.broadcast %74 : vector<1x32xf32> to vector<16x32xf32>
    %76 = arith.addf %73, %75 : vector<16x32xf32>
    %c0_40 = arith.constant 0 : index
    %c0_41 = arith.constant 0 : index
    %77 = vector.load %arg11[%c0_40, %c0_41] : memref<32x32xf32, #tpu.memory_space<vmem>>, vector<32x32xf32>
    %cst_42 = arith.constant dense<0.000000e+00> : vector<16x32xf32>
    %78 = tpu.matmul %66, %77, %cst_42 {dimension_numbers = #tpu.dot_dimension_numbers<[1], [0], [0], [1], [0, 0, 1, 1], [], []>} : vector<16x32xf32>, vector<32x32xf32>, vector<16x32xf32> -> vector<16x32xf32>
    %c0_43 = arith.constant 0 : index
    %c0_44 = arith.constant 0 : index
    %79 = vector.load %arg12[%c0_43, %c0_44] : memref<1x32xf32, #tpu.memory_space<vmem>>, vector<1x32xf32>
    %80 = vector.broadcast %79 : vector<1x32xf32> to vector<16x32xf32>
    %81 = arith.addf %78, %80 : vector<16x32xf32>
    %82 = vector.extract_strided_slice %71 {offsets = [0, 0], sizes = [16, 8], strides = [1, 1]} : vector<16x32xf32> to vector<16x8xf32>
    %83 = vector.extract_strided_slice %71 {offsets = [0, 8], sizes = [16, 8], strides = [1, 1]} : vector<16x32xf32> to vector<16x8xf32>
    %84 = vector.extract_strided_slice %71 {offsets = [0, 16], sizes = [16, 8], strides = [1, 1]} : vector<16x32xf32> to vector<16x8xf32>
    %85 = vector.extract_strided_slice %71 {offsets = [0, 24], sizes = [16, 8], strides = [1, 1]} : vector<16x32xf32> to vector<16x8xf32>
    %86 = vector.shape_cast %82 : vector<16x8xf32> to vector<1x16x8xf32>
    %87 = vector.shape_cast %83 : vector<16x8xf32> to vector<1x16x8xf32>
    %88 = vector.shape_cast %84 : vector<16x8xf32> to vector<1x16x8xf32>
    %89 = vector.shape_cast %85 : vector<16x8xf32> to vector<1x16x8xf32>
    %90 = tpu.concatenate %86, %87, %88, %89 in 0 : vector<1x16x8xf32>, vector<1x16x8xf32>, vector<1x16x8xf32>, vector<1x16x8xf32> -> vector<4x16x8xf32>
    %91 = vector.extract_strided_slice %76 {offsets = [0, 0], sizes = [16, 8], strides = [1, 1]} : vector<16x32xf32> to vector<16x8xf32>
    %92 = vector.extract_strided_slice %76 {offsets = [0, 8], sizes = [16, 8], strides = [1, 1]} : vector<16x32xf32> to vector<16x8xf32>
    %93 = vector.extract_strided_slice %76 {offsets = [0, 16], sizes = [16, 8], strides = [1, 1]} : vector<16x32xf32> to vector<16x8xf32>
    %94 = vector.extract_strided_slice %76 {offsets = [0, 24], sizes = [16, 8], strides = [1, 1]} : vector<16x32xf32> to vector<16x8xf32>
    %95 = vector.shape_cast %91 : vector<16x8xf32> to vector<1x16x8xf32>
    %96 = vector.shape_cast %92 : vector<16x8xf32> to vector<1x16x8xf32>
    %97 = vector.shape_cast %93 : vector<16x8xf32> to vector<1x16x8xf32>
    %98 = vector.shape_cast %94 : vector<16x8xf32> to vector<1x16x8xf32>
    %99 = tpu.concatenate %95, %96, %97, %98 in 0 : vector<1x16x8xf32>, vector<1x16x8xf32>, vector<1x16x8xf32>, vector<1x16x8xf32> -> vector<4x16x8xf32>
    %100 = vector.extract_strided_slice %81 {offsets = [0, 0], sizes = [16, 8], strides = [1, 1]} : vector<16x32xf32> to vector<16x8xf32>
    %101 = vector.extract_strided_slice %81 {offsets = [0, 8], sizes = [16, 8], strides = [1, 1]} : vector<16x32xf32> to vector<16x8xf32>
    %102 = vector.extract_strided_slice %81 {offsets = [0, 16], sizes = [16, 8], strides = [1, 1]} : vector<16x32xf32> to vector<16x8xf32>
    %103 = vector.extract_strided_slice %81 {offsets = [0, 24], sizes = [16, 8], strides = [1, 1]} : vector<16x32xf32> to vector<16x8xf32>
    %104 = vector.shape_cast %100 : vector<16x8xf32> to vector<1x16x8xf32>
    %105 = vector.shape_cast %101 : vector<16x8xf32> to vector<1x16x8xf32>
    %106 = vector.shape_cast %102 : vector<16x8xf32> to vector<1x16x8xf32>
    %107 = vector.shape_cast %103 : vector<16x8xf32> to vector<1x16x8xf32>
    %108 = tpu.concatenate %104, %105, %106, %107 in 0 : vector<1x16x8xf32>, vector<1x16x8xf32>, vector<1x16x8xf32>, vector<1x16x8xf32> -> vector<4x16x8xf32>
    "tpu.trace_start"() <{level = 10 : i32, message = "hqd,hkd->hqk"}> : () -> ()
    %cst_45 = arith.constant dense<0.000000e+00> : vector<4x16x16xf32>
    %109 = tpu.matmul %90, %99, %cst_45 {dimension_numbers = #tpu.dot_dimension_numbers<[2], [2], [1], [1], [0, 0, 0, 1, 1, 1], [0], [0]>} : vector<4x16x8xf32>, vector<4x16x8xf32>, vector<4x16x16xf32> -> vector<4x16x16xf32>
    "tpu.trace_stop"() : () -> ()
    %cst_46 = arith.constant 0.353553385 : f32
    %110 = vector.broadcast %cst_46 : f32 to vector<4x16x16xf32>
    %111 = arith.mulf %109, %110 : vector<4x16x16xf32>
    %c0_47 = arith.constant 0 : index
    %c0_48 = arith.constant 0 : index
    %112 = vector.load %arg6[%c0_47, %c0_48] : memref<16x16xf32, #tpu.memory_space<vmem>>, vector<16x16xf32>
    %113 = vector.shape_cast %112 : vector<16x16xf32> to vector<1x16x16xf32>
    %114 = vector.broadcast %113 : vector<1x16x16xf32> to vector<4x16x16xf32>
    %115 = arith.addf %111, %114 : vector<4x16x16xf32>
    %cst_49 = arith.constant dense<0xFF800000> : vector<4x16xf32>
    %116 = vector.multi_reduction <maximumf>, %115, %cst_49 [2] : vector<4x16x16xf32> to vector<4x16xf32>
    %117 = vector.shape_cast %116 : vector<4x16xf32> to vector<4x16x1xf32>
    %118 = vector.broadcast %117 : vector<4x16x1xf32> to vector<4x16x16xf32>
    %119 = arith.subf %115, %118 : vector<4x16x16xf32>
    %120 = math.exp %119 : vector<4x16x16xf32>
    %cst_50 = arith.constant dense<0.000000e+00> : vector<4x16xf32>
    %121 = vector.multi_reduction <add>, %120, %cst_50 [2] : vector<4x16x16xf32> to vector<4x16xf32>
    %122 = vector.shape_cast %121 : vector<4x16xf32> to vector<4x16x1xf32>
    %123 = tpu.reciprocal %122 {approx = true} : vector<4x16x1xf32> -> vector<4x16x1xf32>
    %124 = vector.broadcast %123 : vector<4x16x1xf32> to vector<4x16x16xf32>
    %125 = arith.mulf %120, %124 : vector<4x16x16xf32>
    "tpu.trace_start"() <{level = 10 : i32, message = "hqk,hkd->hqd"}> : () -> ()
    %cst_51 = arith.constant dense<0.000000e+00> : vector<4x16x8xf32>
    %126 = tpu.matmul %125, %108, %cst_51 {dimension_numbers = #tpu.dot_dimension_numbers<[2], [1], [1], [2], [0, 0, 0, 1, 1, 2], [0], [0]>} : vector<4x16x16xf32>, vector<4x16x8xf32>, vector<4x16x8xf32> -> vector<4x16x8xf32>
    "tpu.trace_stop"() : () -> ()
    %c0_52 = arith.constant 0 : index
    %c0_53 = arith.constant 0 : index
    %127 = vector.load %arg13[%c0_52, %c0_53] : memref<32x32xf32, #tpu.memory_space<vmem>>, vector<32x32xf32>
    %cst_54 = arith.constant 0.000000e+00 : f32
    %128 = vector.broadcast %cst_54 : f32 to vector<16x32xf32>
    %129 = vector.extract_strided_slice %126 {offsets = [0, 0, 0], sizes = [1, 16, 8], strides = [1, 1, 1]} : vector<4x16x8xf32> to vector<1x16x8xf32>
    %130 = vector.shape_cast %129 : vector<1x16x8xf32> to vector<16x8xf32>
    %131 = vector.extract_strided_slice %127 {offsets = [0, 0], sizes = [8, 32], strides = [1, 1]} : vector<32x32xf32> to vector<8x32xf32>
    %cst_55 = arith.constant dense<0.000000e+00> : vector<16x32xf32>
    %132 = tpu.matmul %130, %131, %cst_55 {dimension_numbers = #tpu.dot_dimension_numbers<[1], [0], [0], [1], [0, 0, 1, 1], [], []>} : vector<16x8xf32>, vector<8x32xf32>, vector<16x32xf32> -> vector<16x32xf32>
    %133 = arith.addf %128, %132 : vector<16x32xf32>
    %134 = vector.extract_strided_slice %126 {offsets = [1, 0, 0], sizes = [1, 16, 8], strides = [1, 1, 1]} : vector<4x16x8xf32> to vector<1x16x8xf32>
    %135 = vector.shape_cast %134 : vector<1x16x8xf32> to vector<16x8xf32>
    %136 = vector.extract_strided_slice %127 {offsets = [8, 0], sizes = [8, 32], strides = [1, 1]} : vector<32x32xf32> to vector<8x32xf32>
    %cst_56 = arith.constant dense<0.000000e+00> : vector<16x32xf32>
    %137 = tpu.matmul %135, %136, %cst_56 {dimension_numbers = #tpu.dot_dimension_numbers<[1], [0], [0], [1], [0, 0, 1, 1], [], []>} : vector<16x8xf32>, vector<8x32xf32>, vector<16x32xf32> -> vector<16x32xf32>
    %138 = arith.addf %133, %137 : vector<16x32xf32>
    %139 = vector.extract_strided_slice %126 {offsets = [2, 0, 0], sizes = [1, 16, 8], strides = [1, 1, 1]} : vector<4x16x8xf32> to vector<1x16x8xf32>
    %140 = vector.shape_cast %139 : vector<1x16x8xf32> to vector<16x8xf32>
    %141 = vector.extract_strided_slice %127 {offsets = [16, 0], sizes = [8, 32], strides = [1, 1]} : vector<32x32xf32> to vector<8x32xf32>
    %cst_57 = arith.constant dense<0.000000e+00> : vector<16x32xf32>
    %142 = tpu.matmul %140, %141, %cst_57 {dimension_numbers = #tpu.dot_dimension_numbers<[1], [0], [0], [1], [0, 0, 1, 1], [], []>} : vector<16x8xf32>, vector<8x32xf32>, vector<16x32xf32> -> vector<16x32xf32>
    %143 = arith.addf %138, %142 : vector<16x32xf32>
    %144 = vector.extract_strided_slice %126 {offsets = [3, 0, 0], sizes = [1, 16, 8], strides = [1, 1, 1]} : vector<4x16x8xf32> to vector<1x16x8xf32>
    %145 = vector.shape_cast %144 : vector<1x16x8xf32> to vector<16x8xf32>
    %146 = vector.extract_strided_slice %127 {offsets = [24, 0], sizes = [8, 32], strides = [1, 1]} : vector<32x32xf32> to vector<8x32xf32>
    %cst_58 = arith.constant dense<0.000000e+00> : vector<16x32xf32>
    %147 = tpu.matmul %145, %146, %cst_58 {dimension_numbers = #tpu.dot_dimension_numbers<[1], [0], [0], [1], [0, 0, 1, 1], [], []>} : vector<16x8xf32>, vector<8x32xf32>, vector<16x32xf32> -> vector<16x32xf32>
    %148 = arith.addf %143, %147 : vector<16x32xf32>
    %149 = arith.addf %44, %148 : vector<16x32xf32>
    %c0_59 = arith.constant 0 : index
    %c0_60 = arith.constant 0 : index
    %150 = vector.load %arg14[%c0_59, %c0_60] : memref<1x32xf32, #tpu.memory_space<vmem>>, vector<1x32xf32>
    %151 = vector.broadcast %150 : vector<1x32xf32> to vector<16x32xf32>
    %152 = arith.addf %149, %151 : vector<16x32xf32>
    %c0_61 = arith.constant 0 : index
    %c0_62 = arith.constant 0 : index
    %153 = vector.load %arg21[%c0_61, %c0_62] : memref<1x32xf32, #tpu.memory_space<vmem>>, vector<1x32xf32>
    %c0_63 = arith.constant 0 : index
    %c0_64 = arith.constant 0 : index
    %154 = vector.load %arg22[%c0_63, %c0_64] : memref<1x32xf32, #tpu.memory_space<vmem>>, vector<1x32xf32>
    %cst_65 = arith.constant dense<0.000000e+00> : vector<16xf32>
    %155 = vector.multi_reduction <add>, %152, %cst_65 [1] : vector<16x32xf32> to vector<16xf32>
    %156 = vector.shape_cast %155 : vector<16xf32> to vector<16x1xf32>
    %cst_66 = arith.constant 3.200000e+01 : f32
    %157 = vector.broadcast %cst_66 : f32 to vector<16x1xf32>
    %158 = arith.divf %156, %157 : vector<16x1xf32>
    %159 = vector.broadcast %158 : vector<16x1xf32> to vector<16x32xf32>
    %160 = arith.subf %152, %159 : vector<16x32xf32>
    %161 = arith.mulf %160, %160 : vector<16x32xf32>
    %cst_67 = arith.constant dense<0.000000e+00> : vector<16xf32>
    %162 = vector.multi_reduction <add>, %161, %cst_67 [1] : vector<16x32xf32> to vector<16xf32>
    %163 = vector.shape_cast %162 : vector<16xf32> to vector<16x1xf32>
    %cst_68 = arith.constant 0.0322580636 : f32
    %164 = vector.broadcast %cst_68 : f32 to vector<16x1xf32>
    %165 = arith.mulf %163, %164 : vector<16x1xf32>
    %166 = vector.broadcast %153 : vector<1x32xf32> to vector<16x32xf32>
    %167 = arith.mulf %166, %160 : vector<16x32xf32>
    %168 = math.sqrt %165 : vector<16x1xf32>
    %cst_69 = arith.constant 9.99999997E-7 : f32
    %169 = vector.broadcast %cst_69 : f32 to vector<16x1xf32>
    %170 = arith.addf %168, %169 : vector<16x1xf32>
    %171 = vector.broadcast %170 : vector<16x1xf32> to vector<16x32xf32>
    %172 = arith.divf %167, %171 : vector<16x32xf32>
    %173 = vector.broadcast %154 : vector<1x32xf32> to vector<16x32xf32>
    %174 = arith.addf %172, %173 : vector<16x32xf32>
    %c0_70 = arith.constant 0 : index
    %c0_71 = arith.constant 0 : index
    %175 = vector.load %arg17[%c0_70, %c0_71] : memref<32x64xf32, #tpu.memory_space<vmem>>, vector<32x64xf32>
    %cst_72 = arith.constant dense<0.000000e+00> : vector<16x64xf32>
    %176 = tpu.matmul %174, %175, %cst_72 {dimension_numbers = #tpu.dot_dimension_numbers<[1], [0], [0], [1], [0, 0, 1, 1], [], []>} : vector<16x32xf32>, vector<32x64xf32>, vector<16x64xf32> -> vector<16x64xf32>
    %c0_73 = arith.constant 0 : index
    %c0_74 = arith.constant 0 : index
    %177 = vector.load %arg18[%c0_73, %c0_74] : memref<1x64xf32, #tpu.memory_space<vmem>>, vector<1x64xf32>
    %178 = vector.broadcast %177 : vector<1x64xf32> to vector<16x64xf32>
    %179 = arith.addf %176, %178 : vector<16x64xf32>
    %cst_75 = arith.constant 0.000000e+00 : f32
    %180 = vector.broadcast %cst_75 : f32 to vector<16x64xf32>
    %181 = arith.maximumf %179, %180 : vector<16x64xf32>
    %c0_76 = arith.constant 0 : index
    %c0_77 = arith.constant 0 : index
    %182 = vector.load %arg19[%c0_76, %c0_77] : memref<64x32xf32, #tpu.memory_space<vmem>>, vector<64x32xf32>
    %cst_78 = arith.constant dense<0.000000e+00> : vector<16x32xf32>
    %183 = tpu.matmul %181, %182, %cst_78 {dimension_numbers = #tpu.dot_dimension_numbers<[1], [0], [0], [1], [0, 0, 1, 1], [], []>} : vector<16x64xf32>, vector<64x32xf32>, vector<16x32xf32> -> vector<16x32xf32>
    %c0_79 = arith.constant 0 : index
    %c0_80 = arith.constant 0 : index
    %184 = vector.load %arg20[%c0_79, %c0_80] : memref<1x32xf32, #tpu.memory_space<vmem>>, vector<1x32xf32>
    %185 = vector.broadcast %184 : vector<1x32xf32> to vector<16x32xf32>
    %186 = arith.addf %183, %185 : vector<16x32xf32>
    %187 = arith.addf %152, %186 : vector<16x32xf32>
    %188 = vector.extract_strided_slice %187 {offsets = [0, 0], sizes = [1, 32], strides = [1, 1]} : vector<16x32xf32> to vector<1x32xf32>
    %189 = vector.extract_strided_slice %187 {offsets = [8, 0], sizes = [1, 32], strides = [1, 1]} : vector<16x32xf32> to vector<1x32xf32>
    %190 = tpu.concatenate %188, %189 in 0 : vector<1x32xf32>, vector<1x32xf32> -> vector<2x32xf32>
    %c0_81 = arith.constant 0 : index
    %c0_82 = arith.constant 0 : index
    %191 = vector.load %arg23[%c0_81, %c0_82] : memref<32x3xf32, #tpu.memory_space<vmem>>, vector<32x3xf32>
    %cst_83 = arith.constant dense<0.000000e+00> : vector<2x3xf32>
    %192 = tpu.matmul %190, %191, %cst_83 {dimension_numbers = #tpu.dot_dimension_numbers<[1], [0], [0], [1], [0, 0, 1, 1], [], []>} : vector<2x32xf32>, vector<32x3xf32>, vector<2x3xf32> -> vector<2x3xf32>
    %c0_84 = arith.constant 0 : index
    %c0_85 = arith.constant 0 : index
    %193 = vector.load %arg24[%c0_84, %c0_85] : memref<1x3xf32, #tpu.memory_space<vmem>>, vector<1x3xf32>
    %194 = vector.broadcast %193 : vector<1x3xf32> to vector<2x3xf32>
    %195 = arith.addf %192, %194 : vector<2x3xf32>
    %c0_86 = arith.constant 0 : index
    %c0_87 = arith.constant 0 : index
    %196 = vector.load %arg25[%c0_86, %c0_87] : memref<2x3xf32, #tpu.memory_space<vmem>>, vector<2x3xf32>
    tpu.vector_store %arg25[%c0_86, %c0_87], %195 {strides = array<i32>} : memref<2x3xf32, #tpu.memory_space<vmem>>, vector<2x3xf32>,
    return
  }
  func.func @transform_0(%arg0: i32) -> (i32, i32, i32) {
    %c0_i32 = arith.constant 0 : i32
    %c0_i32_0 = arith.constant 0 : i32
    %c0_i32_1 = arith.constant 0 : i32
    %c0_i32_2 = arith.constant 0 : i32
    return %c0_i32, %c0_i32_0, %c0_i32_1 : i32, i32, i32
  }
  func.func @transform_1(%arg0: i32) -> (i32, i32) {
    %c0_i32 = arith.constant 0 : i32
    %c0_i32_0 = arith.constant 0 : i32
    %c0_i32_1 = arith.constant 0 : i32
    return %c0_i32, %c0_i32_0 : i32, i32
  }
  func.func @transform_2(%arg0: i32) -> (i32, i32) {
    %c0_i32 = arith.constant 0 : i32
    %c0_i32_0 = arith.constant 0 : i32
    %c0_i32_1 = arith.constant 0 : i32
    return %c0_i32, %c0_i32_0 : i32, i32
  }
  func.func @transform_3(%arg0: i32) -> (i32, i32) {
    %c0_i32 = arith.constant 0 : i32
    %c0_i32_0 = arith.constant 0 : i32
    %c0_i32_1 = arith.constant 0 : i32
    return %c0_i32, %c0_i32_0 : i32, i32
  }
  func.func @transform_4(%arg0: i32) -> (i32, i32) {
    %c0_i32 = arith.constant 0 : i32
    %c0_i32_0 = arith.constant 0 : i32
    %c0_i32_1 = arith.constant 0 : i32
    return %c0_i32, %c0_i32_0 : i32, i32
  }
  func.func @transform_5(%arg0: i32) -> (i32, i32) {
    %c0_i32 = arith.constant 0 : i32
    %c0_i32_0 = arith.constant 0 : i32
    %c0_i32_1 = arith.constant 0 : i32
    return %c0_i32, %c0_i32_0 : i32, i32
  }
  func.func @transform_6(%arg0: i32) -> (i32, i32) {
    %c0_i32 = arith.constant 0 : i32
    %c0_i32_0 = arith.constant 0 : i32
    %c0_i32_1 = arith.constant 0 : i32
    return %c0_i32, %c0_i32_0 : i32, i32
  }
  func.func @transform_7(%arg0: i32) -> (i32, i32) {
    %c0_i32 = arith.constant 0 : i32
    %c0_i32_0 = arith.constant 0 : i32
    %c0_i32_1 = arith.constant 0 : i32
    return %c0_i32, %c0_i32_0 : i32, i32
  }
  func.func @transform_8(%arg0: i32) -> (i32, i32) {
    %c0_i32 = arith.constant 0 : i32
    %c0_i32_0 = arith.constant 0 : i32
    %c0_i32_1 = arith.constant 0 : i32
    return %c0_i32, %c0_i32_0 : i32, i32
  }
  func.func @transform_9(%arg0: i32) -> (i32, i32) {
    %c0_i32 = arith.constant 0 : i32
    %c0_i32_0 = arith.constant 0 : i32
    %c0_i32_1 = arith.constant 0 : i32
    return %c0_i32, %c0_i32_0 : i32, i32
  }
  func.func @transform_10(%arg0: i32) -> (i32, i32) {
    %c0_i32 = arith.constant 0 : i32
    %c0_i32_0 = arith.constant 0 : i32
    %c0_i32_1 = arith.constant 0 : i32
    return %c0_i32, %c0_i32_0 : i32, i32
  }
  func.func @transform_11(%arg0: i32) -> (i32, i32) {
    %c0_i32 = arith.constant 0 : i32
    %c0_i32_0 = arith.constant 0 : i32
    %c0_i32_1 = arith.constant 0 : i32
    return %c0_i32, %c0_i32_0 : i32, i32
  }
  func.func @transform_12(%arg0: i32) -> (i32, i32) {
    %c0_i32 = arith.constant 0 : i32
    %c0_i32_0 = arith.constant 0 : i32
    %c0_i32_1 = arith.constant 0 : i32
    return %c0_i32, %c0_i32_0 : i32, i32
  }
  func.func @transform_13(%arg0: i32) -> (i32, i32) {
    %c0_i32 = arith.constant 0 : i32
    %c0_i32_0 = arith.constant 0 : i32
    %c0_i32_1 = arith.constant 0 : i32
    return %c0_i32, %c0_i32_0 : i32, i32
  }
  func.func @transform_14(%arg0: i32) -> (i32, i32) {
    %c0_i32 = arith.constant 0 : i32
    %c0_i32_0 = arith.constant 0 : i32
    %c0_i32_1 = arith.constant 0 : i32
    return %c0_i32, %c0_i32_0 : i32, i32
  }
  func.func @transform_15(%arg0: i32) -> (i32, i32) {
    %c0_i32 = arith.constant 0 : i32
    %c0_i32_0 = arith.constant 0 : i32
    %c0_i32_1 = arith.constant 0 : i32
    return %c0_i32, %c0_i32_0 : i32, i32
  }
  func.func @transform_16(%arg0: i32) -> (i32, i32) {
    %c0_i32 = arith.constant 0 : i32
    %c0_i32_0 = arith.constant 0 : i32
    %c0_i32_1 = arith.constant 0 : i32
    return %c0_i32, %c0_i32_0 : i32, i32
  }
  func.func @transform_17(%arg0: i32) -> (i32, i32) {
    %c0_i32 = arith.constant 0 : i32
    %c0_i32_0 = arith.constant 0 : i32
    %c0_i32_1 = arith.constant 0 : i32
    return %c0_i32, %c0_i32_0 : i32, i32
  }
  func.func @transform_18(%arg0: i32) -> (i32, i32) {
    %c0_i32 = arith.constant 0 : i32
    %c0_i32_0 = arith.constant 0 : i32
    %c0_i32_1 = arith.constant 0 : i32
    return %c0_i32, %c0_i32_0 : i32, i32
  }
  func.func @transform_19(%arg0: i32) -> (i32, i32) {
    %c0_i32 = arith.constant 0 : i32
    %c0_i32_0 = arith.constant 0 : i32
    %c0_i32_1 = arith.constant 0 : i32
    return %c0_i32, %c0_i32_0 : i32, i32
  }
  func.func @transform_20(%arg0: i32) -> (i32, i32) {
    %c0_i32 = arith.constant 0 : i32
    %c0_i32_0 = arith.constant 0 : i32
    %c0_i32_1 = arith.constant 0 : i32
    return %c0_i32, %c0_i32_0 : i32, i32
  }
  func.func @transform_21(%arg0: i32) -> (i32, i32) {
    %c0_i32 = arith.constant 0 : i32
    %c0_i32_0 = arith.constant 0 : i32
    %c0_i32_1 = arith.constant 0 : i32
    return %c0_i32, %c0_i32_0 : i32, i32
  }
  func.func @transform_22(%arg0: i32) -> (i32, i32) {
    %c0_i32 = arith.constant 0 : i32
    %c0_i32_0 = arith.constant 0 : i32
    %c0_i32_1 = arith.constant 0 : i32
    return %c0_i32, %c0_i32_0 : i32, i32
  }
  func.func @transform_23(%arg0: i32) -> (i32, i32) {
    %c0_i32 = arith.constant 0 : i32
    %c0_i32_0 = arith.constant 0 : i32
    %c0_i32_1 = arith.constant 0 : i32
    return %c0_i32, %c0_i32_0 : i32, i32
  }
  func.func @transform_24(%arg0: i32) -> (i32, i32) {
    %c0_i32 = arith.constant 0 : i32
    %c0_i32_0 = arith.constant 0 : i32
    %c0_i32_1 = arith.constant 0 : i32
    return %c0_i32, %c0_i32_0 : i32, i32
  }
}

</mosaic_0001>

<bundles_post_ra>
// kernel: forward.1
= control target key start
LH: loop header
LB: loop body
LE: loop exit
PB: predicated region body
PF: predicated region fallthrough
CT: control target
= control target key end

     0   :  { %s4001_s0 = inlined_call_operand.vmem [shape: f32[2,16,4], index: 0, kind: input, shape index: {}]   ;;  %s4002_s1 = inlined_call_operand.vmem [shape: f32[12,31], index: 1, kind: input, shape index: {}]   ;;  %s4003_s2 = inlined_call_operand.hbm [shape: f32[1,31], index: 2, kind: input, shape index: {}]   ;;  %s4004_s3 = inlined_call_operand.vmem [shape: f32[7,13], index: 3, kind: input, shape index: {}]   ;;  %s4005_s4 = inlined_call_operand.vmem [shape: f32[8,32], index: 4, kind: input, shape index: {}]   ;;  %s4006_s5 = inlined_call_operand.hbm [shape: f32[16,16], index: 5, kind: input, shape index: {}]   ;;  %s4007_s6 = inlined_call_operand.vmem [shape: f32[32,32], index: 6, kind: input, shape index: {}]   ;;  %s4008_s7 = inlined_call_operand.hbm [shape: f32[1,32], index: 7, kind: input, shape index: {}]   ;;  %s4009_s8 = inlined_call_operand.vmem [shape: f32[32,32], index: 8, kind: input, shape index: {}]   ;;  %s4010_s9 = inlined_call_operand.hbm [shape: f32[1,32], index: 9, kind: input, shape index: {}]   ;;  %s4011_s10 = inlined_call_operand.vmem [shape: f32[32,32], index: 10, kind: input, shape index: {}]   ;;  %s4012_s11 = inlined_call_operand.hbm [shape: f32[1,32], index: 11, kind: input, shape index: {}]   ;;  %s4013_s12 = inlined_call_operand.vmem [shape: f32[32,32], index: 12, kind: input, shape index: {}]   ;;  %s4014_s13 = inlined_call_operand.hbm [shape: f32[1,32], index: 13, kind: input, shape index: {}]   ;;  %s4015_s14 = inlined_call_operand.hbm [shape: f32[1,32], index: 14, kind: input, shape index: {}]   ;;  %s4016_s15 = inlined_call_operand.hbm [shape: f32[1,32], index: 15, kind: input, shape index: {}]   ;;  %s4017_s16 = inlined_call_operand.vmem [shape: f32[32,64], index: 16, kind: input, shape index: {}]   ;;  %s4018_s17 = inlined_call_operand.hbm [shape: f32[1,64], index: 17, kind: input, shape index: {}]   ;;  %s4019_s18 = inlined_call_operand.vmem [shape: f32[64,32], index: 18, kind: input, shape index: {}]   ;;  %s4020_s19 = inlined_call_operand.hbm [shape: f32[1,32], index: 19, kind: input, shape index: {}]   ;;  %s4021_s20 = inlined_call_operand.hbm [shape: f32[1,32], index: 20, kind: input, shape index: {}]   ;;  %s4022_s21 = inlined_call_operand.hbm [shape: f32[1,32], index: 21, kind: input, shape index: {}]   ;;  %s4023_s22 = inlined_call_operand.vmem [shape: f32[32,3], index: 22, kind: input, shape index: {}]   ;;  %s4024_s23 = inlined_call_operand.hbm [shape: f32[1,3], index: 23, kind: input, shape index: {}]   ;;  %s4025_s24 = inlined_call_operand.hbm [shape: f32[2,3], index: 24, kind: output, shape index: {}]  }
   0x1   :  { %4035 = sst [smem:[#allocation32_spill]] %s4001_s0 }
   0x2   :  { %4036 = sst [smem:[#allocation33_spill]] %s4002_s1 }
   0x3   :  { %4037 = sst [smem:[#allocation34_spill]] %s4003_s2 }
   0x4   :  { %4038 = sst [smem:[#allocation35_spill]] %s4004_s3 }
   0x5   :  { %4039 = sst [smem:[#allocation36_spill]] %s4005_s4 }
   0x6   :  { %4040 = sst [smem:[#allocation37_spill]] %s4006_s5 }
   0x7   :  { %4041 = sst [smem:[#allocation38_spill]] %s4007_s6 }
   0x8   :  { %4042 = sst [smem:[#allocation39_spill]] %s4008_s7 }
   0x9   :  { %4043 = sst [smem:[#allocation40_spill]] %s4009_s8 }
   0xa   :  { %4044 = sst [smem:[#allocation41_spill]] %s4023_s22 }
   0xb   :  { %4045 = sst [smem:[#allocation42_spill]] %s4025_s24 }
   0xc   :  { %29 = vsyncpa [#allocation3], 0 }
   0xd   :  { %30 = vsyncpa [#allocation6], 0 }
   0xe   :  { %31 = vsyncpa [#allocation9], 0 }
   0xf   :  { %32 = vsyncpa [#allocation12], 0 }
  0x10   :  { %33 = vsyncpa [#allocation15], 0 }
  0x11   :  { %34 = vsyncpa [#allocation18], 0 }
  0x12   :  { %35 = vsyncpa [#allocation21], 0 }
  0x13   :  { %36 = vsyncpa [#allocation4], 0  ;;  %s3389_s5 = smov [#allocation5]   ;;  %s4046_s6 = sld [smem:[#allocation37_spill]] }
  0x14   :  { %s60_s26 = sshll.u32 %s3389_s5, 4  ;;  %s61_s26 = int_to_ptr.vmem [resolvable:$true] %s60_s26 }
  0x19   :  { %s3065_s2 = scalar_lea.hbm %s4046_s6, 256 }
  0x1a   :  { %p3066_p0 = scmp.ne.s32.totalorder %s4046_s6, %s3065_s2  ;;  %p3069_p1 = scmp.lt.u32.totalorder %s3065_s2, %s4046_s6 }
  0x1c   :  { %p3071_p2 = pnand %p3069_p1, %p3066_p0 }
  0x1e   :  { %3074 = shalt.err (!%p3071_p2)
}
  0x1f   :  { %s3075_s3 = scalar_lea.vmem %s61_s26, 256  ;;  %p3080_p4 = scmp.lt.s32.totalorder %s61_s26, %s61_s26 }
  0x20   :  { %p3076_p3 = scmp.ne.s32.totalorder %s61_s26, %s3075_s3  ;;  %p3081_p5 = scmp.lt.s32.totalorder %s3075_s3, %s3075_s3 }
  0x22   :  { %p3082_p6 = por %p3081_p5, %p3080_p4 }
  0x24   :  { %p3083_p7 = pnand %p3082_p6, %p3076_p3 }
  0x26   :  { %3086 = shalt.err (!%p3083_p7)
}
  0x27   :  { %s3390_s25 = smov 128   ;;  %s3391_s8 = smov 8  }
  0x28   :  { %66 = dma.hbm_to_vmem [thread:$0]  %s4046_s6, 256, %s61_s26, [#allocation6], %s3390_s25, %s3390_s25, %s3391_s8  }
  0x29   :  { %s3392_s5 = smov [#allocation8]   ;;  %s3393_s28 = smov [#allocation11]  }
  0x2a   :  { %s87_s27 = sshll.u32 %s3392_s5, 4  ;;  %s111_s2 = sshll.u32 %s3393_s28, 4  ;;  %s88_s27 = int_to_ptr.vmem [resolvable:$true] %s87_s27  ;;  %s112_s2 = int_to_ptr.vmem [resolvable:$true] %s111_s2 }
  0x2b   :  { %s3087_s7 = scalar_lea.hbm %s4010_s9, 16 }
  0x2c   :  { %p3088_p8 = scmp.ne.s32.totalorder %s4010_s9, %s3087_s7  ;;  %p3091_p9 = scmp.lt.u32.totalorder %s3087_s7, %s4010_s9 }
  0x2e   :  { %p3093_p10 = pnand %p3091_p9, %p3088_p8 }
  0x30   :  { %3096 = shalt.err (!%p3093_p10)
}
  0x31   :  { %s3097_s26 = scalar_lea.vmem %s88_s27, 16  ;;  %s3101_s6 = scalar_lea.vmem %s88_s27, 32 }
  0x32   :  { %p3098_p11 = scmp.ne.s32.totalorder %s88_s27, %s3097_s26  ;;  %p3102_p12 = scmp.lt.s32.totalorder %s88_s27, %s88_s27 }
  0x33   :  { %p3103_p13 = scmp.lt.s32.totalorder %s3101_s6, %s3097_s26 }
  0x35   :  { %p3104_p0 = por %p3103_p13, %p3102_p12 }
  0x37   :  { %p3105_p1 = pnand %p3104_p0, %p3098_p11 }
  0x39   :  { %3108 = shalt.err (!%p3105_p1)
}
  0x3a   :  { %90 = dma.hbm_to_vmem [thread:$0]  %s4010_s9, 16, %s88_s27, [#allocation9]  }
  0x3b   :  { %s3109_s22 = scalar_lea.hbm %s4014_s13, 16 }
  0x3c   :  { %p3110_p2 = scmp.ne.s32.totalorder %s4014_s13, %s3109_s22  ;;  %p3113_p3 = scmp.lt.u32.totalorder %s3109_s22, %s4014_s13 }
  0x3e   :  { %p3115_p4 = pnand %p3113_p3, %p3110_p2 }
  0x40   :  { %3118 = shalt.err (!%p3115_p4)
}
  0x41   :  { %s3119_s7 = scalar_lea.vmem %s112_s2, 16  ;;  %s3123_s30 = scalar_lea.vmem %s112_s2, 32 }
  0x42   :  { %p3120_p5 = scmp.ne.s32.totalorder %s112_s2, %s3119_s7  ;;  %p3124_p6 = scmp.lt.s32.totalorder %s112_s2, %s112_s2 }
  0x43   :  { %p3125_p7 = scmp.lt.s32.totalorder %s3123_s30, %s3119_s7 }
  0x45   :  { %p3126_p8 = por %p3125_p7, %p3124_p6 }
  0x47   :  { %p3127_p9 = pnand %p3126_p8, %p3120_p5 }
  0x49   :  { %3130 = shalt.err (!%p3127_p9)
}
  0x4a   :  { %114 = dma.hbm_to_vmem [thread:$0]  %s4014_s13, 16, %s112_s2, [#allocation12]  }
  0x4b   :  { %s3394_s3 = smov [#allocation14]   ;;  %s3395_s6 = smov [#allocation17]  }
  0x4c   :  { %s131_s26 = sshll.u32 %s3394_s3, 4  ;;  %s155_s25 = sshll.u32 %s3395_s6, 4  ;;  %s132_s26 = int_to_ptr.vmem [resolvable:$true] %s131_s26  ;;  %s156_s25 = int_to_ptr.vmem [resolvable:$true] %s155_s25 }
  0x4d   :  { %s3131_s5 = scalar_lea.hbm %s4016_s15, 16 }
  0x4e   :  { %p3132_p10 = scmp.ne.s32.totalorder %s4016_s15, %s3131_s5  ;;  %p3135_p11 = scmp.lt.u32.totalorder %s3131_s5, %s4016_s15 }
  0x50   :  { %p3137_p12 = pnand %p3135_p11, %p3132_p10 }
  0x52   :  { %3140 = shalt.err (!%p3137_p12)
}
  0x53   :  { %s3141_s13 = scalar_lea.vmem %s132_s26, 16  ;;  %s3145_s2 = scalar_lea.vmem %s132_s26, 32 }
  0x54   :  { %p3142_p13 = scmp.ne.s32.totalorder %s132_s26, %s3141_s13  ;;  %p3146_p0 = scmp.lt.s32.totalorder %s132_s26, %s132_s26 }
  0x55   :  { %p3147_p1 = scmp.lt.s32.totalorder %s3145_s2, %s3141_s13 }
  0x57   :  { %p3148_p2 = por %p3147_p1, %p3146_p0 }
  0x59   :  { %p3149_p3 = pnand %p3148_p2, %p3142_p13 }
  0x5b   :  { %3152 = shalt.err (!%p3149_p3)
}
  0x5c   :  { %134 = dma.hbm_to_vmem [thread:$0]  %s4016_s15, 16, %s132_s26, [#allocation15]  }
  0x5d   :  { %s3153_s27 = scalar_lea.hbm %s4020_s19, 16 }
  0x5e   :  { %p3154_p4 = scmp.ne.s32.totalorder %s4020_s19, %s3153_s27  ;;  %p3157_p5 = scmp.lt.u32.totalorder %s3153_s27, %s4020_s19 }
  0x60   :  { %p3159_p6 = pnand %p3157_p5, %p3154_p4 }
  0x62   :  { %3162 = shalt.err (!%p3159_p6)
}
  0x63   :  { %s3163_s5 = scalar_lea.vmem %s156_s25, 16  ;;  %s3167_s22 = scalar_lea.vmem %s156_s25, 32 }
  0x64   :  { %p3164_p7 = scmp.ne.s32.totalorder %s156_s25, %s3163_s5  ;;  %p3168_p8 = scmp.lt.s32.totalorder %s156_s25, %s156_s25 }
  0x65   :  { %p3169_p9 = scmp.lt.s32.totalorder %s3167_s22, %s3163_s5 }
  0x67   :  { %p3170_p10 = por %p3169_p9, %p3168_p8 }
  0x69   :  { %p3171_p11 = pnand %p3170_p10, %p3164_p7 }
  0x6b   :  { %3174 = shalt.err (!%p3171_p11)
}
  0x6c   :  { %158 = dma.hbm_to_vmem [thread:$0]  %s4020_s19, 16, %s156_s25, [#allocation18]  }
  0x6d   :  { %s3396_s24 = smov [#allocation20]   ;;  %s3397_s29 = smov [#allocation2]  }
  0x6e   :  { %s175_s28 = sshll.u32 %s3396_s24, 4  ;;  %s47_s13 = sshll.u32 %s3397_s29, 4  ;;  %s176_s28 = int_to_ptr.vmem [resolvable:$true] %s175_s28  ;;  %s48_s13 = int_to_ptr.vmem [resolvable:$true] %s47_s13 }
  0x6f   :  { %s3175_s7 = scalar_lea.hbm %s4022_s21, 16 }
  0x70   :  { %p3176_p12 = scmp.ne.s32.totalorder %s4022_s21, %s3175_s7  ;;  %p3179_p13 = scmp.lt.u32.totalorder %s3175_s7, %s4022_s21 }
  0x72   :  { %p3181_p0 = pnand %p3179_p13, %p3176_p12 }
  0x74   :  { %3184 = shalt.err (!%p3181_p0)
}
  0x75   :  { %s3185_s19 = scalar_lea.vmem %s176_s28, 16  ;;  %s3189_s25 = scalar_lea.vmem %s176_s28, 32 }
  0x76   :  { %p3186_p1 = scmp.ne.s32.totalorder %s176_s28, %s3185_s19  ;;  %p3190_p2 = scmp.lt.s32.totalorder %s176_s28, %s176_s28 }
  0x77   :  { %p3191_p3 = scmp.lt.s32.totalorder %s3189_s25, %s3185_s19 }
  0x79   :  { %p3192_p4 = por %p3191_p3, %p3190_p2 }
  0x7b   :  { %p3193_p5 = pnand %p3192_p4, %p3186_p1 }
  0x7d   :  { %3196 = shalt.err (!%p3193_p5)
}
  0x7e   :  { %178 = dma.hbm_to_vmem [thread:$0]  %s4022_s21, 16, %s176_s28, [#allocation21]  }
  0x7f   :  { %s4047_s22 = sld [smem:[#allocation34_spill]] }
  0x85   :  { %s3197_s15 = scalar_lea.hbm %s4047_s22, 16 }
  0x86   :  { %p3198_p6 = scmp.ne.s32.totalorder %s4047_s22, %s3197_s15  ;;  %p3201_p7 = scmp.lt.u32.totalorder %s3197_s15, %s4047_s22 }
  0x88   :  { %p3203_p8 = pnand %p3201_p7, %p3198_p6 }
  0x8a   :  { %3206 = shalt.err (!%p3203_p8)
}
  0x8b   :  { %s3207_s0 = scalar_lea.vmem %s48_s13, 16  ;;  %s3211_s7 = scalar_lea.vmem %s48_s13, 32 }
  0x8c   :  { %p3208_p9 = scmp.ne.s32.totalorder %s48_s13, %s3207_s0  ;;  %p3212_p10 = scmp.lt.s32.totalorder %s48_s13, %s48_s13 }
  0x8d   :  { %p3213_p11 = scmp.lt.s32.totalorder %s3211_s7, %s3207_s0 }
  0x8f   :  { %p3214_p12 = por %p3213_p11, %p3212_p10 }
  0x91   :  { %p3215_p13 = pnand %p3214_p12, %p3208_p9 }
  0x93   :  { %3218 = shalt.err (!%p3215_p13)
}
  0x94   :  { %50 = dma.hbm_to_vmem [thread:$0]  %s4047_s22, 16, %s48_s13, [#allocation3]  }
  0x95   :  { %s3398_s30 = smov [#allocation7]   ;;  %s3399_s27 = smov [#allocation10]  }
  0x96   :  { %s75_s9 = sshll.u32 %s3398_s30, 4  ;;  %s99_s3 = sshll.u32 %s3399_s27, 4  ;;  %s76_s9 = int_to_ptr.vmem [resolvable:$true] %s75_s9  ;;  %s100_s3 = int_to_ptr.vmem [resolvable:$true] %s99_s3 }
  0x97   :  { %s4048_s6 = sld [smem:[#allocation39_spill]] }
  0x9d   :  { %s3219_s4 = scalar_lea.hbm %s4048_s6, 16 }
  0x9e   :  { %p3220_p0 = scmp.ne.s32.totalorder %s4048_s6, %s3219_s4  ;;  %p3223_p1 = scmp.lt.u32.totalorder %s3219_s4, %s4048_s6 }
  0xa0   :  { %p3225_p2 = pnand %p3223_p1, %p3220_p0 }
  0xa2   :  { %3228 = shalt.err (!%p3225_p2)
}
  0xa3   :  { %s3229_s13 = scalar_lea.vmem %s76_s9, 16  ;;  %s3233_s22 = scalar_lea.vmem %s76_s9, 32 }
  0xa4   :  { %p3230_p3 = scmp.ne.s32.totalorder %s76_s9, %s3229_s13  ;;  %p3234_p4 = scmp.lt.s32.totalorder %s76_s9, %s76_s9 }
  0xa5   :  { %p3235_p5 = scmp.lt.s32.totalorder %s3233_s22, %s3229_s13 }
  0xa7   :  { %p3236_p6 = por %p3235_p5, %p3234_p4 }
  0xa9   :  { %p3237_p7 = pnand %p3236_p6, %p3230_p3 }
  0xab   :  { %3240 = shalt.err (!%p3237_p7)
}
  0xac   :  { %78 = dma.hbm_to_vmem [thread:$0]  %s4048_s6, 16, %s76_s9, [#allocation6]  }
  0xad   :  { %s3241_s7 = scalar_lea.hbm %s4012_s11, 16 }
  0xae   :  { %p3242_p8 = scmp.ne.s32.totalorder %s4012_s11, %s3241_s7  ;;  %p3245_p9 = scmp.lt.u32.totalorder %s3241_s7, %s4012_s11 }
  0xb0   :  { %p3247_p10 = pnand %p3245_p9, %p3242_p8 }
  0xb2   :  { %3250 = shalt.err (!%p3247_p10)
}
  0xb3   :  { %s3251_s19 = scalar_lea.vmem %s100_s3, 16  ;;  %s3255_s25 = scalar_lea.vmem %s100_s3, 32 }
  0xb4   :  { %p3252_p11 = scmp.ne.s32.totalorder %s100_s3, %s3251_s19  ;;  %p3256_p12 = scmp.lt.s32.totalorder %s100_s3, %s100_s3 }
  0xb5   :  { %p3257_p13 = scmp.lt.s32.totalorder %s3255_s25, %s3251_s19 }
  0xb7   :  { %p3258_p0 = por %p3257_p13, %p3256_p12 }
  0xb9   :  { %p3259_p1 = pnand %p3258_p0, %p3252_p11 }
  0xbb   :  { %3262 = shalt.err (!%p3259_p1)
}
  0xbc   :  { %102 = dma.hbm_to_vmem [thread:$0]  %s4012_s11, 16, %s100_s3, [#allocation9]  }
  0xbd   :  { %s3400_s4 = smov [#allocation13]   ;;  %s3401_s5 = smov [#allocation16]  }
  0xbe   :  { %s121_s1 = sshll.u32 %s3400_s4, 4  ;;  %s143_s15 = sshll.u32 %s3401_s5, 4  ;;  %s122_s1 = int_to_ptr.vmem [resolvable:$true] %s121_s1  ;;  %s144_s15 = int_to_ptr.vmem [resolvable:$true] %s143_s15 }
  0xbf   :  { %s3263_s22 = scalar_lea.hbm %s4015_s14, 16 }
  0xc0   :  { %p3264_p2 = scmp.ne.s32.totalorder %s4015_s14, %s3263_s22  ;;  %p3267_p3 = scmp.lt.u32.totalorder %s3263_s22, %s4015_s14 }
  0xc2   :  { %p3269_p4 = pnand %p3267_p3, %p3264_p2 }
  0xc4   :  { %3272 = shalt.err (!%p3269_p4)
}
  0xc5   :  { %s3273_s11 = scalar_lea.vmem %s122_s1, 16  ;;  %s3277_s3 = scalar_lea.vmem %s122_s1, 32 }
  0xc6   :  { %p3274_p5 = scmp.ne.s32.totalorder %s122_s1, %s3273_s11  ;;  %p3278_p6 = scmp.lt.s32.totalorder %s122_s1, %s122_s1 }
  0xc7   :  { %p3279_p7 = scmp.lt.s32.totalorder %s3277_s3, %s3273_s11 }
  0xc9   :  { %p3280_p8 = por %p3279_p7, %p3278_p6 }
  0xcb   :  { %p3281_p9 = pnand %p3280_p8, %p3274_p5 }
  0xcd   :  { %3284 = shalt.err (!%p3281_p9)
}
  0xce   :  { %124 = dma.hbm_to_vmem [thread:$0]  %s4015_s14, 16, %s122_s1, [#allocation12]  }
  0xcf   :  { %s3285_s27 = scalar_lea.hbm %s4018_s17, 16 }
  0xd0   :  { %p3286_p10 = scmp.ne.s32.totalorder %s4018_s17, %s3285_s27  ;;  %p3289_p11 = scmp.lt.u32.totalorder %s3285_s27, %s4018_s17 }
  0xd2   :  { %p3291_p12 = pnand %p3289_p11, %p3286_p10 }
  0xd4   :  { %3294 = shalt.err (!%p3291_p12)
}
  0xd5   :  { %s3295_s4 = scalar_lea.vmem %s144_s15, 16  ;;  %s3299_s5 = scalar_lea.vmem %s144_s15, 32 }
  0xd6   :  { %p3296_p13 = scmp.ne.s32.totalorder %s144_s15, %s3295_s4  ;;  %p3300_p0 = scmp.lt.s32.totalorder %s144_s15, %s144_s15 }
  0xd7   :  { %p3301_p1 = scmp.lt.s32.totalorder %s3299_s5, %s3295_s4 }
  0xd9   :  { %p3302_p2 = por %p3301_p1, %p3300_p0 }
  0xdb   :  { %p3303_p3 = pnand %p3302_p2, %p3296_p13 }
  0xdd   :  { %3306 = shalt.err (!%p3303_p3)
}
  0xde   :  { %146 = dma.hbm_to_vmem [thread:$0]  %s4018_s17, 16, %s144_s15, [#allocation15]  }
  0xdf   :  { %s3402_s26 = smov [#allocation19]   ;;  %s3403_s22 = smov [#allocation22]  }
  0xe0   :  { %s165_s13 = sshll.u32 %s3402_s26, 4  ;;  %s187_s24 = sshll.u32 %s3403_s22, 4  ;;  %s166_s13 = int_to_ptr.vmem [resolvable:$true] %s165_s13  ;;  %s188_s24 = int_to_ptr.vmem [resolvable:$true] %s187_s24 }
  0xe1   :  { %s3307_s0 = scalar_lea.hbm %s4021_s20, 16 }
  0xe2   :  { %p3308_p4 = scmp.ne.s32.totalorder %s4021_s20, %s3307_s0  ;;  %p3311_p5 = scmp.lt.u32.totalorder %s3307_s0, %s4021_s20 }
  0xe4   :  { %p3313_p6 = pnand %p3311_p5, %p3308_p4 }
  0xe6   :  { %3316 = shalt.err (!%p3313_p6)
}
  0xe7   :  { %s3317_s17 = scalar_lea.vmem %s166_s13, 16  ;;  %s3321_s15 = scalar_lea.vmem %s166_s13, 32 }
  0xe8   :  { %p3318_p7 = scmp.ne.s32.totalorder %s166_s13, %s3317_s17  ;;  %p3322_p8 = scmp.lt.s32.totalorder %s166_s13, %s166_s13 }
  0xe9   :  { %p3323_p9 = scmp.lt.s32.totalorder %s3321_s15, %s3317_s17 }
  0xeb   :  { %p3324_p10 = por %p3323_p9, %p3322_p8 }
  0xed   :  { %p3325_p11 = pnand %p3324_p10, %p3318_p7 }
  0xef   :  { %3328 = shalt.err (!%p3325_p11)
}
  0xf0   :  { %168 = dma.hbm_to_vmem [thread:$0]  %s4021_s20, 16, %s166_s13, [#allocation18]  }
  0xf1   :  { %s3329_s25 = scalar_lea.hbm %s4024_s23, 16 }
  0xf2   :  { %p3330_p12 = scmp.ne.s32.totalorder %s4024_s23, %s3329_s25  ;;  %p3333_p13 = scmp.lt.u32.totalorder %s3329_s25, %s4024_s23 }
  0xf4   :  { %p3335_p0 = pnand %p3333_p13, %p3330_p12 }
  0xf6   :  { %3338 = shalt.err (!%p3335_p0)
}
  0xf7   :  { %s3339_s14 = scalar_lea.vmem %s188_s24, 16  ;;  %s3343_s1 = scalar_lea.vmem %s188_s24, 32 }
  0xf8   :  { %p3340_p1 = scmp.ne.s32.totalorder %s188_s24, %s3339_s14  ;;  %p3344_p2 = scmp.lt.s32.totalorder %s188_s24, %s188_s24 }
  0xf9   :  { %p3345_p3 = scmp.lt.s32.totalorder %s3343_s1, %s3339_s14 }
  0xfb   :  { %p3346_p4 = por %p3345_p3, %p3344_p2 }
  0xfd   :  { %p3347_p5 = pnand %p3346_p4, %p3340_p1 }
  0xff   :  { %3350 = shalt.err (!%p3347_p5)
}
 0x100   :  { %190 = dma.hbm_to_vmem [thread:$0]  %s4024_s23, 16, %s188_s24, [#allocation21]  }
 0x101   :  { %3373 = dma.done.wait [#allocation3], 16  }
 0x102   :  { %3374 = vsyncadd [#allocation3], 4294967280 }
 0x103   :  { %3375 = dma.done.wait [#allocation6], 272  }
 0x104   :  { %3376 = vsyncadd [#allocation6], 4294967024 }
 0x105   :  { %3377 = dma.done.wait [#allocation9], 32  }
 0x106   :  { %3378 = vsyncadd [#allocation9], 4294967264 }
 0x107   :  { %3379 = dma.done.wait [#allocation12], 32  }
 0x108   :  { %3380 = vsyncadd [#allocation12], 4294967264 }
 0x109   :  { %3381 = dma.done.wait [#allocation15], 32  }
 0x10a   :  { %3382 = vsyncadd [#allocation15], 4294967264 }
 0x10b   :  { %3383 = dma.done.wait [#allocation18], 32  }
 0x10c   :  { %3384 = vsyncadd [#allocation18], 4294967264 }
 0x10d   :  { %3385 = dma.done.wait [#allocation21], 32  }
 0x10e   :  { %3386 = vsyncadd [#allocation21], 4294967264  ;;  %vm278_vm0 = vcmask 1043456   ;;  %s4049_s29 = sld [smem:[#allocation32_spill]]  ;;  %vm249_vm1 = vcmask 1045504   ;;  %vm239_vm2 = vcmask 1046528  }
 0x10f   :  { %s4050_s17 = sld [smem:[#allocation33_spill]]  ;;  %vm3404_vm3 = vmmov 1   ;;  %s3405_s30 = smov 4   ;;  %vm259_vm5 = vcmask 31744   ;;  %vm262_vm6 = vcmask 64512   ;;  %vm271_vm7 = vcmask 97280  }
 0x110   :  { %vm3715_vm4 = vmpackc.low %vm278_vm0, %vm3404_vm3  ;;  %v3406_v36 = vmov 0.0|0.0   ;;  %vm3407_vm8 = vmmov 0   ;;  %v3408_v37 = vmov 0.0   ;;  %v2500_v38 = vld [vmem:[#allocation2] ss:$0 sm:$0xff]  ;;  %vm372_vm9 = vcmask 1044480  }
 0x111   :  { %2848 = vmatprep.subr.bf16.mxu1 %v3406_v36  ;;  %2675 = vmatprep.mubr.msk.f32.mxu1 %vm3407_vm8, %v3408_v37  ;;  %vm2850_vm10 = vmpackc.low %vm372_vm9, %vm3404_vm3  ;;  %s4053_s19 = sld [smem:[#allocation35_spill]]  ;;  %vm368_vm11 = vcmask 105472   ;;  %s3409_s25 = smov 1   ;;  %vm450_vm12 = vcmask 7168   ;;  %vm455_vm13 = vcmask 1040384   ;;  %vm662_vm14 = vcmask 261120  }
 0x112   :  { %s4054_s4 = sld [smem:[#allocation36_spill]]  ;;  %s4055_s1 = sld [smem:[#allocation38_spill]]  ;;  %vm3816_vm3 = vmpackc.low %vm262_vm6, %vm262_vm6  ;;  %vm2305_vm9 = vcmask 523264  }
 0x113   :  { %s3412_s5 = smov 112   ;;  %s4059_s13 = sld [smem:[#allocation41_spill]] }
 0x114   :  { %v236_v0 = vld [vmem:[%s4049_s29 + $0x8] sm:$0xff]  ;;  %v235_v1 = vld [vmem:[%s4049_s29] sm:$0xff]  ;;  %v2507_v2 = vld [vmem:[%s4049_s29 + $0x18] sm:$0xff]  ;;  %s3413_s2 = smov [#allocation23]  }
 0x115   :  { %v251_v3 = vrot.slane %v236_v0, 2  ;;  %v241_v4 = vrot.slane %v236_v0, 1  ;;  %v250_v5 = vrot.slane %v235_v1, 2  ;;  %v240_v6 = vrot.slane %v235_v1, 1  ;;  %v2506_v7 = vld [vmem:[%s4049_s29 + $0x10] sm:$0xff]  ;;  %v230_v8 = vld [vmem:[%s4050_s17] sm:$0xff] }
 0x116   :  { %v231_v9 = vld [vmem:[%s4050_s17 + $0x8] sm:$0xf]  ;;  %v464_v14 = vrot.slane %v2507_v2, 1  ;;  %v463_v15 = vrot.slane %v2506_v7, 1  ;;  %v473_v17 = vrot.slane %v2507_v2, 2  ;;  %v472_v18 = vrot.slane %v2506_v7, 2 }
 0x117   :  { %255 = vrot.lane.b32.xlu1 %v251_v3, %s3391_s8  ;;  %245 = vrot.lane.b32.xlu0 %v241_v4, %s3405_s30  ;;  %v2842_v11 = vpack.c.bf16 %v231_v9, %v230_v8  ;;  %v252_v12 = vsel %vm249_vm1, %v250_v5, %v251_v3  ;;  %v242_v13 = vsel %vm239_vm2, %v240_v6, %v241_v4  ;;  %v233_v59 = vld [vmem:[%s4053_s19] sm:$0x7f]  ;;  %s4056_s29 = sld [smem:[#allocation40_spill]]  ;;  %s2485_s0 = sshll.u32 %s3413_s2, 4  ;;  %s2486_s0 = int_to_ptr.vmem [resolvable:$true] %s2485_s0 }
 0x118   :  { %v465_v16 = vsel %vm239_vm2, %v463_v15, %v464_v14  ;;  %v474_v19 = vsel %vm249_vm1, %v472_v18, %v473_v17  ;;  %v234_v6 = vld [vmem:[%s4054_s4] sm:$0xff]  ;;  %s3411_s4 = smov 104   ;;  %s3351_s11 = scalar_lea.vmem %s2486_s0, 32 }
 0x119   :  { %2844 = vmatprep.subr.msk.bf16.mxu0 %vm3715_vm4, %v2842_v11  ;;  %p3352_p6 = scmp.ne.s32.totalorder %s2486_s0, %s3351_s11  ;;  %p3356_p7 = scmp.lt.s32.totalorder %s2486_s0, %s2486_s0 }
 0x11a   :  { %2847 = vmatpush3.bf16.msk.msra.mxu0 %vm3715_vm4, %v2842_v11  ;;  %p3357_p8 = scmp.lt.s32.totalorder %s3351_s11, %s3351_s11 }
 0x11b   :  { %253 = vrot.lane.b32.xlu1 %v252_v12, %s3391_s8  ;;  %243 = vrot.lane.b32.xlu0 %v242_v13, %s3405_s30 }
 0x11c   :  { %2854 = vmatprep.subr.msk.bf16.mxu0 %vm3715_vm4, %v2842_v11  ;;  %p3358_p9 = por %p3357_p8, %p3356_p7 }
 0x11e   :  { %p3359_p10 = pnand %p3358_p9, %p3352_p6 }
 0x11f   :  { %468 = vrot.lane.b32.xlu1 %v464_v14, %s3405_s30  ;;  %466 = vrot.lane.b32.xlu0 %v465_v16, %s3405_s30 }
 0x123   :  { %477 = vrot.lane.b32.xlu1 %v473_v17, %s3391_s8  ;;  %475 = vrot.lane.b32.xlu0 %v474_v19, %s3391_s8 }
 0x189   :  { %v256_v20 = vpop.permute.xlu1 %255  ;;  %v246_v21 = vpop.permute.xlu0 %245 }
 0x18a   :  { %v261_v22 = vsel %vm259_vm5, %v236_v0, %v246_v21 }
 0x18b   :  { %v264_v27 = vsel %vm262_vm6, %v261_v22, %v256_v20 }
 0x18d   :  { %v254_v23 = vpop.permute.xlu1 %253  ;;  %v244_v24 = vpop.permute.xlu0 %243 }
 0x18e   :  { %v260_v25 = vsel %vm259_vm5, %v235_v1, %v244_v24 }
 0x18f   :  { %v263_v26 = vsel %vm262_vm6, %v260_v25, %v254_v23 }
 0x190   :  { %2668 = vmatprep.mubr.msk.f32.mxu0 %vm271_vm7, %v263_v26 }
 0x191   :  { %v469_v28 = vpop.permute.xlu1 %468  ;;  %v467_v29 = vpop.permute.xlu0 %466  ;;  %2669 = vmatmul.mubr.msk.f32.vlgmr.msra.gmra.mrb[0].mxu0 %vm271_vm7, %v264_v27  ;;  %v720_v27 = vld [vmem:[%s4055_s1] sm:$0xff] }
 0x192   :  { %2857 = vmatpush3.bf16.msk.msra.mxu0 %vm3715_vm4, %v2842_v11  ;;  %v482_v30 = vsel %vm259_vm5, %v2507_v2, %v469_v28  ;;  %v481_v31 = vsel %vm259_vm5, %v2506_v7, %v467_v29  ;;  %v721_v28 = vld [vmem:[%s4055_s1 + $0x8] sm:$0xff]  ;;  %v812_v29 = vld [vmem:[%s4056_s29] sm:$0xff]  ;;  %vm1382_vm4 = vcmask 130048  }
 0x195   :  { %v478_v32 = vpop.permute.xlu1 %477  ;;  %v476_v33 = vpop.permute.xlu0 %475 }
 0x196   :  { %v484_v34 = vsel %vm262_vm6, %v482_v30, %v478_v32  ;;  %v483_v35 = vsel %vm262_vm6, %v481_v31, %v476_v33  ;;  %v2862_v30 = vpack.c.bf16 %v721_v28, %v720_v27  ;;  %v813_v31 = vld [vmem:[%s4056_s29 + $0x8] sm:$0xff]  ;;  %v722_v33 = vld [vmem:[%s4055_s1 + $0x10] sm:$0xff] }
 0x197   :  { %2682 = vmatprep.mubr.msk.f32.mxu0 %vm271_vm7, %v483_v35  ;;  %v2870_v32 = vpack.c.bf16 %v813_v31, %v812_v29 }
 0x198   :  { %2683 = vmatmul.mubr.msk.f32.vlgmr.msra.gmra.mrb[2].mxu0 %vm271_vm7, %v484_v34  ;;  %2863 = vmatprep.subr.bf16.mxu0 %v2862_v30  ;;  %v723_v34 = vld [vmem:[%s4055_s1 + $0x18] sm:$0xff] }
 0x199   :  { %2865 = vmatpush3.bf16.msra.mxu0 %v2862_v30  ;;  %v2866_v35 = vpack.c.bf16 %v723_v34, %v722_v33 }
 0x19b   :  { %2867 = vmatprep.subr.bf16.mxu0 %v2866_v35 }
 0x19d   :  { %2869 = vmatpush3.bf16.msra.mxu0 %v2866_v35 }
 0x264   :  { %v2670_v39 = vpop.f32.mrb[0].mxu0 }
 0x265   :  { %v354_v40 = vadd.f32 %v2670_v39, %v2500_v38  ;;  %v348_v41 = vpop.f32.mrb[1].mxu0  ;;  %v815_v39 = vld [vmem:[%s4056_s29 + $0x18] sm:$0xff] }
 0x266   :  { %v349_v42 = vadd.f32 %v2500_v38, %v348_v41  ;;  %v898_v41 = vld [vmem:[%s4011_s10] sm:$0xff] }
 0x267   :  { %v358_v43 = vmax.f32 %v354_v40, 0.0 }
 0x268   :  { %v357_v44 = vmax.f32 %v349_v42, 0.0  ;;  %v899_v42 = vld [vmem:[%s4011_s10 + $0x8] sm:$0xff] }
 0x269   :  { %v362_v45 = vrot.slane %v358_v43, 1 }
 0x26a   :  { %v361_v46 = vrot.slane %v357_v44, 1 }
 0x26b   :  { %v2684_v47 = vpop.f32.mrb[2].mxu0  ;;  %v367_v51 = vmax.f32 %v358_v43, %v362_v45  ;;  %v2878_v43 = vpack.c.bf16 %v899_v42, %v898_v41 }
 0x26c   :  { %v363_v48 = vsel %vm239_vm2, %v361_v46, %v362_v45  ;;  %v563_v49 = vadd.f32 %v2684_v47, %v2500_v38  ;;  %v557_v50 = vpop.f32.mrb[3].mxu0 }
 0x26d   :  { %v366_v52 = vmax.f32 %v357_v44, %v363_v48  ;;  %v558_v53 = vadd.f32 %v2500_v38, %v557_v50  ;;  %v814_v38 = vld [vmem:[%s4056_s29 + $0x10] sm:$0xff]  ;;  %2879 = vmatprep.subr.bf16.mxu0 %v2878_v43 }
 0x26e   :  { %v567_v54 = vmax.f32 %v563_v49, 0.0  ;;  %v2874_v40 = vpack.c.bf16 %v815_v39, %v814_v38 }
 0x26f   :  { %v566_v55 = vmax.f32 %v558_v53, 0.0  ;;  %v2849_v56 = vpack.c.bf16 %v367_v51, %v366_v52 }
 0x270   :  { %v571_v57 = vrot.slane %v567_v54, 1 }
 0x271   :  { %v570_v58 = vrot.slane %v566_v55, 1  ;;  %2851 = vmatpush3.bf16.msk.msra.mxu1 %vm2850_vm10, %v2849_v56 }
 0x272   :  { %2858 = vmatprep.subr.bf16.mxu1 %v3406_v36  ;;  %v576_v61 = vmax.f32 %v567_v54, %v571_v57 }
 0x273   :  { %v572_v60 = vsel %vm239_vm2, %v570_v58, %v571_v57 }
 0x274   :  { %v575_v62 = vmax.f32 %v566_v55, %v572_v60  ;;  %2676 = vmatmul.mubr.msk.f32.vlgmr.msra.gmra.mrb[0].mxu1 %vm368_vm11, %v233_v59  ;;  %v2513_v60 = vld [vmem:[#allocation13] ss:$0 sm:$0xff] }
 0x275   :  { %2689 = vmatprep.mubr.msk.f32.mxu1 %vm3407_vm8, %v3408_v37 }
 0x276   :  { %v2859_v63 = vpack.c.bf16 %v576_v61, %v575_v62 }
 0x278   :  { %2861 = vmatpush3.bf16.msk.msra.mxu1 %vm2850_vm10, %v2859_v63  ;;  %v2514_v63 = vld [vmem:[#allocation14] ss:$0 sm:$0xff]  ;;  %vm2477_vm10 = vcmask 17408  }
 0x279   :  { %2871 = vmatprep.subr.bf16.mxu1 %v2870_v32 }
 0x27b   :  { %2690 = vmatmul.mubr.msk.f32.vlgmr.msra.gmra.mrb[2].mxu1 %vm368_vm11, %v233_v59 }
 0x27c   :  { %2873 = vmatpush3.bf16.msra.mxu1 %v2870_v32 }
 0x27d   :  { %2875 = vmatprep.subr.bf16.mxu1 %v2874_v40 }
 0x280   :  { %2877 = vmatpush3.bf16.msra.mxu1 %v2874_v40 }
 0x347   :  { %v442_v0 = vpop.f32.mrb[0].mxu1 }
 0x348   :  { %447 = vrot.lane.b32.xlu0 %v442_v0, %s3409_s25  ;;  %v2677_v1 = vpop.f32.mrb[1].mxu1 }
 0x34e   :  { %v646_v2 = vpop.f32.mrb[2].mxu1 }
 0x34f   :  { %651 = vrot.lane.b32.xlu1 %v646_v2, %s3409_s25  ;;  %v2691_v3 = vpop.f32.mrb[3].mxu1 }
 0x3ba   :  { %v448_v4 = vpop.permute.xlu0 %447 }
 0x3bb   :  { %v451_v5 = vsel %vm450_vm12, 0.0, %v448_v4  ;;  %v900_v4 = vld [vmem:[%s4011_s10 + $0x10] sm:$0xff] }
 0x3bc   :  { %v453_v7 = vrot.slane %v451_v5, 7  ;;  %v901_v5 = vld [vmem:[%s4011_s10 + $0x18] sm:$0xff]  ;;  %s3410_s10 = smov 120  }
 0x3be   :  { %v456_v8 = vsel %vm455_vm13, 0.0, %v453_v7 }
 0x3bf   :  { %v3759_v9 = vadd.f32 %v456_v8, %v234_v6  ;;  %v2882_v8 = vpack.c.bf16 %v901_v5, %v900_v4 }
 0x3c1   :  { %v652_v10 = vpop.permute.xlu1 %651  ;;  %v663_v11 = vsel %vm662_vm14, %v3759_v9, 0.0 }
 0x3c2   :  { %v654_v12 = vsel %vm450_vm12, 0.0, %v652_v10  ;;  %664 = vadd.xlane.f32.xlu0 %v663_v11  ;;  %v2518_v10 = vld [vmem:[#allocation8] ss:$0 sm:$0xff]  ;;  %v2515_v11 = vld [vmem:[#allocation7] ss:$0 sm:$0xff] }
 0x3c3   :  { %v656_v13 = vrot.slane %v654_v12, 7 }
 0x3c5   :  { %v658_v14 = vsel %vm455_vm13, 0.0, %v656_v13 }
 0x3c6   :  { %v3764_v15 = vadd.f32 %v658_v14, %v234_v6 }
 0x3c8   :  { %v666_v16 = vsel %vm662_vm14, %v3764_v15, 0.0 }
 0x3c9   :  { %667 = vadd.xlane.f32.xlu1 %v666_v16 }
 0x44f   :  { %v665_v17 = vpop.xlane.xlu0 %664 }
 0x450   :  { %v670_v18 = vmul.f32 0.03125, %v665_v17 }
 0x452   :  { %v672_v19 = vsub.f32 %v3759_v9, %v670_v18 }
 0x454   :  { %v674_v20 = vmul.f32 %v672_v19, %v672_v19  ;;  %v690_v61 = vmul.f32 %v2513_v60, %v672_v19 }
 0x456   :  { %v668_v21 = vpop.xlane.xlu1 %667  ;;  %v676_v22 = vsel %vm662_vm14, %v674_v20, 0.0 }
 0x457   :  { %v671_v23 = vmul.f32 0.03125, %v668_v21  ;;  %677 = vadd.xlane.f32.xlu0 %v676_v22 }
 0x459   :  { %v673_v24 = vsub.f32 %v3764_v15, %v671_v23  ;;  %v2521_v23 = vld [vmem:[#allocation10] ss:$0 sm:$0xff] }
 0x45b   :  { %v675_v25 = vmul.f32 %v673_v24, %v673_v24  ;;  %v691_v2 = vmul.f32 %v2513_v60, %v673_v24 }
 0x45d   :  { %v679_v26 = vsel %vm662_vm14, %v675_v25, 0.0 }
 0x45e   :  { %680 = vadd.xlane.f32.xlu0 %v679_v26 }
 0x4e4   :  { %v678_v44 = vpop.xlane.xlu0 %677 }
 0x4e5   :  { %v682_v45 = vmul.f32 0.032258064, %v678_v44 }
 0x4e7   :  { %3017 = vrsqrt.f32 %v682_v45  ;;  %vm694_vm15 = vcmp.eq.f32.partialorder %v682_v45, inf  ;;  %v697_v50 = vand.u32 2147483648, %v682_v45  ;;  %vm696_vm0 = vcmp.eq.f32.partialorder %v682_v45, 0.0 }
 0x4eb   :  { %v681_v46 = vpop.xlane.xlu0 %680 }
 0x4ec   :  { %v683_v47 = vmul.f32 0.032258064, %v681_v46 }
 0x4ee   :  { %3019 = vrsqrt.f32 %v683_v47  ;;  %vm701_vm1 = vcmp.eq.f32.partialorder %v683_v47, inf  ;;  %v704_v56 = vand.u32 2147483648, %v683_v47  ;;  %vm703_vm2 = vcmp.eq.f32.partialorder %v683_v47, 0.0 }
 0x4f1   :  { %v3018_v48 = vpop.eup %3017 }
 0x4f2   :  { %v693_v49 = vmul.f32 %v3018_v48, %v682_v45 }
 0x4f4   :  { %v695_v51 = vsel %vm694_vm15, %v682_v45, %v693_v49 }
 0x4f5   :  { %v698_v52 = vsel %vm696_vm0, %v697_v50, %v695_v51 }
 0x4f6   :  { %v706_v53 = vadd.f32 1e-06, %v698_v52  ;;  %v1373_v52 = vld [vmem:[#allocation5 + $0x8] sm:$0xff] }
 0x4f8   :  { %v3020_v54 = vpop.eup %3019  ;;  %3021 = vrcp.f32 %v706_v53 }
 0x4f9   :  { %v700_v55 = vmul.f32 %v3020_v54, %v683_v47 }
 0x4fb   :  { %v702_v57 = vsel %vm701_vm1, %v683_v47, %v700_v55  ;;  %v1372_v55 = vld [vmem:[#allocation5] sm:$0xff] }
 0x4fc   :  { %v705_v58 = vsel %vm703_vm2, %v704_v56, %v702_v57 }
 0x4fd   :  { %v707_v59 = vadd.f32 1e-06, %v705_v58 }
 0x4ff   :  { %3023 = vrcp.f32 %v707_v59 }
 0x502   :  { %v3022_v62 = vpop.eup %3021 }
 0x503   :  { %v709_v0 = vmul.f32 %v3022_v62, %v690_v61 }
 0x505   :  { %v718_v1 = vadd.f32 %v2514_v63, %v709_v0 }
 0x507   :  { %2700 = vmatprep.mubr.msk.f32.mxu0 %vm662_vm14, %v718_v1  ;;  %2711 = vmatprep.mubr.msk.f32.mxu1 %vm662_vm14, %v718_v1 }
 0x509   :  { %v3024_v3 = vpop.eup %3023 }
 0x50a   :  { %v711_v6 = vmul.f32 %v3024_v3, %v691_v2 }
 0x50c   :  { %v719_v7 = vadd.f32 %v2514_v63, %v711_v6 }
 0x50e   :  { %2701 = vmatmul.mubr.msk.f32.vlgmr.msra.gmra.mrb[4].mxu0 %vm662_vm14, %v719_v7  ;;  %2712 = vmatmul.mubr.msk.f32.vlgmr.msra.gmra.mrb[4].mxu1 %vm662_vm14, %v719_v7 }
 0x50f   :  { %2881 = vmatpush3.bf16.msra.mxu0 %v2878_v43  ;;  %2722 = vmatprep.mubr.msk.f32.mxu0 %vm662_vm14, %v718_v1 }
 0x510   :  { %2883 = vmatprep.subr.bf16.mxu0 %v2882_v8 }
 0x513   :  { %2885 = vmatpush3.bf16.msra.mxu0 %v2882_v8 }
 0x516   :  { %2723 = vmatmul.mubr.msk.f32.vlgmr.msra.gmra.mrb[6].mxu0 %vm662_vm14, %v719_v7 }
 0x5e1   :  { %v2702_v12 = vpop.f32.mrb[4].mxu0  ;;  %v2713_v13 = vpop.f32.mrb[4].mxu1 }
 0x5e2   :  { %v895_v14 = vadd.f32 %v2713_v13, %v2518_v10  ;;  %v803_v16 = vpop.f32.mrb[5].mxu0  ;;  %v889_v17 = vpop.f32.mrb[5].mxu1  ;;  %v809_v24 = vadd.f32 %v2702_v12, %v2515_v11 }
 0x5e3   :  { %v804_v18 = vadd.f32 %v2515_v11, %v803_v16  ;;  %v890_v19 = vadd.f32 %v2518_v10, %v889_v17 }
 0x5e5   :  { %986 = vrot.lane.b32.xlu0 %v804_v18, %s3410_s10  ;;  %2729 = vmatprep.mubr.msk.f32.mxu1 %vm262_vm6, %v804_v18  ;;  %v2987_v21 = vpack.i.bf16 %v895_v14, %v890_v19  ;;  %v2886_v22 = vpack.c.bf16 %v895_v14, %v890_v19 }
 0x5e7   :  { %2988 = vrot.lane.b32.xlu1 %v2987_v21, %s3410_s10  ;;  %2888 = vmatprep.subr.msk.bf16.mxu1 %vm3816_vm3, %v2886_v22 }
 0x5e8   :  { %2891 = vmatpush3.bf16.xpose.msk.msra.mxu1 %vm3816_vm3, %v2886_v22 }
 0x5e9   :  { %v2724_v25 = vpop.f32.mrb[6].mxu0  ;;  %2998 = vrot.lane.b32.xlu0 %v2987_v21, %s3411_s4 }
 0x5ea   :  { %v981_v26 = vadd.f32 %v2724_v25, %v2521_v23  ;;  %v975_v27 = vpop.f32.mrb[7].mxu0 }
 0x5eb   :  { %v976_v28 = vadd.f32 %v2521_v23, %v975_v27  ;;  %988 = vrot.lane.b32.xlu1 %v809_v24, %s3410_s10 }
 0x5ed   :  { %992 = vrot.lane.b32.xlu0 %v809_v24, %s3412_s5  ;;  %v2910_v29 = vpack.c.bf16 %v981_v26, %v976_v28  ;;  %v3830_v30 = vpack.i.bf16 %v981_v26, %v976_v28 }
 0x5ef   :  { %2993 = vrot.lane.b32.xlu1 %v2987_v21, %s3412_s5  ;;  %2730 = vmatmul.mubr.msk.f32.vlgmr.msra.gmra.mrb[6].mxu1 %vm262_vm6, %v809_v24 }
 0x5f1   :  { %996 = vrot.lane.b32.xlu0 %v809_v24, %s3411_s4 }
 0x5f3   :  { %990 = vrot.lane.b32.xlu1 %v804_v18, %s3412_s5 }
 0x5f7   :  { %994 = vrot.lane.b32.xlu1 %v804_v18, %s3411_s4 }
 0x657   :  { %v987_v31 = vpop.permute.xlu0 %986 }
 0x658   :  { %2736 = vmatprep.mubr.msk.f32.mxu0 %vm262_vm6, %v987_v31 }
 0x659   :  { %v2989_v32 = vpop.permute.xlu1 %2988 }
 0x65a   :  { %v2991_v33 = vunpack.i.h.bf16 %v2989_v32  ;;  %v2990_v34 = vunpack.i.l.bf16 %v2989_v32 }
 0x65b   :  { %v2999_v35 = vpop.permute.xlu0 %2998 }
 0x65c   :  { %v2892_v38 = vpack.c.bf16 %v2991_v33, %v2990_v34  ;;  %v3001_v39 = vunpack.i.h.bf16 %v2999_v35  ;;  %v3000_v40 = vunpack.i.l.bf16 %v2999_v35 }
 0x65d   :  { %v989_v41 = vpop.permute.xlu1 %988 }
 0x65e   :  { %v2904_v42 = vpack.c.bf16 %v3001_v39, %v3000_v40  ;;  %2894 = vmatprep.subr.msk.bf16.mxu0 %vm3816_vm3, %v2892_v38 }
 0x65f   :  { %2897 = vmatpush3.bf16.xpose.msk.msra.mxu0 %vm3816_vm3, %v2892_v38  ;;  %v993_v48 = vpop.permute.xlu0 %992 }
 0x660   :  { %2906 = vmatprep.subr.msk.bf16.mxu0 %vm3816_vm3, %v2904_v42 }
 0x661   :  { %v2994_v43 = vpop.permute.xlu1 %2993 }
 0x662   :  { %v2996_v44 = vunpack.i.h.bf16 %v2994_v43  ;;  %v2995_v45 = vunpack.i.l.bf16 %v2994_v43 }
 0x663   :  { %v997_v50 = vpop.permute.xlu0 %996 }
 0x664   :  { %v2898_v46 = vpack.c.bf16 %v2996_v44, %v2995_v45 }
 0x665   :  { %v991_v47 = vpop.permute.xlu1 %990 }
 0x666   :  { %2737 = vmatmul.mubr.msk.f32.vlgmr.msra.gmra.mrb[8].mxu0 %vm262_vm6, %v989_v41  ;;  %2900 = vmatprep.subr.msk.bf16.mxu1 %vm3816_vm3, %v2898_v46 }
 0x667   :  { %2743 = vmatprep.mubr.msk.f32.mxu1 %vm262_vm6, %v991_v47  ;;  %2903 = vmatpush3.bf16.xpose.msk.msra.mxu1 %vm3816_vm3, %v2898_v46 }
 0x668   :  { %2909 = vmatpush3.bf16.xpose.msk.msra.mxu0 %vm3816_vm3, %v2904_v42  ;;  %2911 = vmatprep.subr.bf16.mxu1 %v2910_v29 }
 0x669   :  { %v995_v49 = vpop.permute.xlu1 %994 }
 0x66a   :  { %2750 = vmatprep.mubr.msk.f32.mxu0 %vm262_vm6, %v995_v49 }
 0x66e   :  { %2744 = vmatmul.mubr.msk.f32.vlgmr.msra.gmra.mrb[8].mxu1 %vm262_vm6, %v993_v48 }
 0x66f   :  { %2751 = vmatmul.mubr.msk.f32.vlgmr.msra.gmra.mrb[10].mxu0 %vm262_vm6, %v997_v50  ;;  %2913 = vmatpush3.bf16.msra.mxu1 %v2910_v29 }
 0x6c2   :  { %v2731_v51 = vpop.f32.mrb[6].mxu1 }
 0x6c3   :  { %v1365_v53 = vmul.f32 0.35355338, %v2731_v51  ;;  %v1106_v54 = vpop.f32.mrb[7].mxu1 }
 0x6c4   :  { %v1364_v56 = vmul.f32 0.35355338, %v1106_v54 }
 0x6c5   :  { %v1375_v57 = vadd.f32 %v1373_v52, %v1365_v53 }
 0x6c6   :  { %v1374_v58 = vadd.f32 %v1372_v55, %v1364_v56 }
 0x6c7   :  { %v1386_v59 = vsel %vm1382_vm4, %v1375_v57, -inf }
 0x6c8   :  { %1387 = vmax.xlane.f32.xlu0 %v1386_v59  ;;  %v1383_v60 = vsel %vm1382_vm4, %v1374_v58, -inf }
 0x6c9   :  { %1384 = vmax.xlane.f32.xlu1 %v1383_v60 }
 0x739   :  { %v2738_v61 = vpop.f32.mrb[8].mxu0 }
 0x73a   :  { %v1367_v62 = vmul.f32 0.35355338, %v2738_v61  ;;  %v1189_v63 = vpop.f32.mrb[9].mxu0 }
 0x73b   :  { %v1366_v0 = vmul.f32 0.35355338, %v1189_v63 }
 0x73c   :  { %v1377_v1 = vadd.f32 %v1373_v52, %v1367_v62 }
 0x73d   :  { %v1376_v2 = vadd.f32 %v1372_v55, %v1366_v0 }
 0x73e   :  { %v1392_v3 = vsel %vm1382_vm4, %v1377_v1, -inf }
 0x73f   :  { %1393 = vmax.xlane.f32.xlu1 %v1392_v3  ;;  %v1389_v4 = vsel %vm1382_vm4, %v1376_v2, -inf }
 0x740   :  { %1390 = vmax.xlane.f32.xlu0 %v1389_v4 }
 0x741   :  { %v2745_v5 = vpop.f32.mrb[8].mxu1 }
 0x742   :  { %v1369_v6 = vmul.f32 0.35355338, %v2745_v5  ;;  %v2752_v7 = vpop.f32.mrb[10].mxu0  ;;  %v1272_v8 = vpop.f32.mrb[9].mxu1 }
 0x743   :  { %v1371_v10 = vmul.f32 0.35355338, %v2752_v7  ;;  %v1368_v11 = vmul.f32 0.35355338, %v1272_v8  ;;  %v1355_v12 = vpop.f32.mrb[11].mxu0 }
 0x744   :  { %v1370_v13 = vmul.f32 0.35355338, %v1355_v12  ;;  %v1379_v14 = vadd.f32 %v1373_v52, %v1369_v6 }
 0x745   :  { %v3859_v16 = vadd.f32 %v1372_v55, %v1368_v11  ;;  %v1381_v18 = vadd.f32 %v1373_v52, %v1371_v10 }
 0x746   :  { %v1398_v17 = vsel %vm1382_vm4, %v1379_v14, -inf  ;;  %v1380_v20 = vadd.f32 %v1372_v55, %v1370_v13 }
 0x747   :  { %1399 = vmax.xlane.f32.xlu1 %v1398_v17  ;;  %v1395_v19 = vsel %vm1382_vm4, %v3859_v16, -inf  ;;  %v1404_v21 = vsel %vm1382_vm4, %v1381_v18, -inf }
 0x748   :  { %1396 = vmax.xlane.f32.xlu0 %v1395_v19  ;;  %v1401_v22 = vsel %vm1382_vm4, %v1380_v20, -inf }
 0x74b   :  { %1405 = vmax.xlane.f32.xlu1 %v1404_v21 }
 0x74c   :  { %1402 = vmax.xlane.f32.xlu0 %v1401_v22 }
 0x755   :  { %v1388_v23 = vpop.xlane.xlu0 %1387 }
 0x756   :  { %v1408_v24 = vsub.f32 %v1375_v57, %v1388_v23  ;;  %v1385_v25 = vpop.xlane.xlu1 %1384 }
 0x757   :  { %v1407_v26 = vsub.f32 %v1374_v58, %v1385_v25 }
 0x758   :  { %v1417_v27 = vmul.f32 1.442695, %v1408_v24 }
 0x759   :  { %v1415_v28 = vmul.f32 1.442695, %v1407_v26 }
 0x75a   :  { %3025 = vpow2.f32 %v1417_v27 }
 0x75b   :  { %3027 = vpow2.f32 %v1415_v28 }
 0x764   :  { %v3026_v29 = vpop.eup %3025 }
 0x765   :  { %v3028_v31 = vpop.eup %3027  ;;  %v1434_v32 = vsel %vm1382_vm4, %v3026_v29, 0.0 }
 0x766   :  { %1435 = vadd.xlane.f32.xlu1 %v1434_v32  ;;  %v1431_v33 = vsel %vm1382_vm4, %v3028_v31, 0.0 }
 0x767   :  { %1432 = vadd.xlane.f32.xlu0 %v1431_v33 }
 0x7cc   :  { %v1394_v34 = vpop.xlane.xlu1 %1393 }
 0x7cd   :  { %v1410_v35 = vsub.f32 %v1377_v1, %v1394_v34  ;;  %v1391_v38 = vpop.xlane.xlu0 %1390 }
 0x7ce   :  { %v1409_v39 = vsub.f32 %v1376_v2, %v1391_v38 }
 0x7cf   :  { %v1421_v40 = vmul.f32 1.442695, %v1410_v35 }
 0x7d0   :  { %v1419_v41 = vmul.f32 1.442695, %v1409_v39 }
 0x7d1   :  { %3029 = vpow2.f32 %v1421_v40 }
 0x7d2   :  { %3031 = vpow2.f32 %v1419_v41 }
 0x7d4   :  { %v1400_v42 = vpop.xlane.xlu1 %1399 }
 0x7d5   :  { %v1412_v43 = vsub.f32 %v1379_v14, %v1400_v42  ;;  %v1397_v44 = vpop.xlane.xlu0 %1396  ;;  %v1796_v42 = vld [vmem:[%s4013_s12 + $0x8] sm:$0xff] }
 0x7d6   :  { %v1411_v0 = vsub.f32 %v3859_v16, %v1397_v44 }
 0x7d7   :  { %v1425_v45 = vmul.f32 1.442695, %v1412_v43  ;;  %v1795_v43 = vld [vmem:[%s4013_s12] sm:$0xff] }
 0x7d8   :  { %v1406_v46 = vpop.xlane.xlu1 %1405  ;;  %v1423_v4 = vmul.f32 1.442695, %v1411_v0 }
 0x7d9   :  { %3033 = vpow2.f32 %v1425_v45  ;;  %v1414_v47 = vsub.f32 %v1381_v18, %v1406_v46  ;;  %v1403_v48 = vpop.xlane.xlu0 %1402 }
 0x7da   :  { %v1413_v49 = vsub.f32 %v1380_v20, %v1403_v48  ;;  %v1797_v48 = vld [vmem:[%s4013_s12 + $0x10] sm:$0xff] }
 0x7db   :  { %v3030_v50 = vpop.eup %3029  ;;  %v1429_v51 = vmul.f32 1.442695, %v1414_v47 }
 0x7dc   :  { %v3032_v52 = vpop.eup %3031  ;;  %v1427_v53 = vmul.f32 1.442695, %v1413_v49  ;;  %v1440_v54 = vsel %vm1382_vm4, %v3030_v50, 0.0  ;;  %v1798_v49 = vld [vmem:[%s4013_s12 + $0x18] sm:$0xff] }
 0x7dd   :  { %3035 = vpow2.f32 %v1429_v51  ;;  %1441 = vadd.xlane.f32.xlu1 %v1440_v54  ;;  %v1437_v55 = vsel %vm1382_vm4, %v3032_v52, 0.0 }
 0x7de   :  { %1438 = vadd.xlane.f32.xlu0 %v1437_v55  ;;  %3037 = vpow2.f32 %v1427_v53  ;;  %v2556_v55 = vld [vmem:[#allocation11] ss:$0 sm:$0xff] }
 0x7e3   :  { %v3870_v56 = vpop.eup %3033 }
 0x7e4   :  { %v1446_v57 = vsel %vm1382_vm4, %v3870_v56, 0.0 }
 0x7e5   :  { %1447 = vadd.xlane.f32.xlu1 %v1446_v57 }
 0x7e7   :  { %v3874_v58 = vpop.eup %3035 }
 0x7e8   :  { %v1452_v59 = vsel %vm1382_vm4, %v3874_v58, 0.0  ;;  %v3038_v60 = vpop.eup %3037 }
 0x7e9   :  { %1453 = vadd.xlane.f32.xlu1 %v1452_v59  ;;  %v1449_v61 = vsel %vm1382_vm4, %v3038_v60, 0.0 }
 0x7ed   :  { %1450 = vadd.xlane.f32.xlu1 %v1449_v61 }
 0x7f3   :  { %v1436_v62 = vpop.xlane.xlu1 %1435 }
 0x7f4   :  { %3039 = vrcp.f32 %v1436_v62  ;;  %3003 = vrot.lane.b32.xlu0 %v3830_v30, %s3410_s10  ;;  %v1433_v63 = vpop.xlane.xlu0 %1432 }
 0x7f5   :  { %3041 = vrcp.f32 %v1433_v63 }
 0x7f6   :  { %3043 = vpow2.f32 %v1423_v4 }
 0x7fe   :  { %v3040_v1 = vpop.eup %3039  ;;  %3008 = vrot.lane.b32.xlu1 %v3830_v30, %s3412_s5 }
 0x7ff   :  { %v3042_v2 = vpop.eup %3041  ;;  %v1464_v5 = vmul.f32 %v3040_v1, %v3026_v29 }
 0x800   :  { %v1463_v3 = vmul.f32 %v3042_v2, %v3028_v31  ;;  %v3044_v6 = vpop.eup %3043 }
 0x801   :  { %v1443_v7 = vsel %vm1382_vm4, %v3044_v6, 0.0 }
 0x802   :  { %2757 = vmatprep.mubr.msk.f32.mxu1 %vm1382_vm4, %v1463_v3 }
 0x803   :  { %2758 = vmatmul.mubr.msk.f32.vlgmr.msra.gmra.mrb[10].mxu1 %vm1382_vm4, %v1464_v5 }
 0x813   :  { %1444 = vadd.xlane.f32.xlu0 %v1443_v7  ;;  %v2197_v7 = vld [vmem:[%s4017_s16 + $0x8] sm:$0xff] }
 0x829   :  { %3013 = vrot.lane.b32.xlu0 %v3830_v30, %s3411_s4 }
 0x86a   :  { %v1442_v8 = vpop.xlane.xlu1 %1441 }
 0x86b   :  { %3045 = vrcp.f32 %v1442_v8  ;;  %v1439_v10 = vpop.xlane.xlu0 %1438  ;;  %v2198_v8 = vld [vmem:[%s4017_s16 + $0x10] sm:$0xff] }
 0x86c   :  { %3047 = vrcp.f32 %v1439_v10 }
 0x86f   :  { %v3004_v11 = vpop.permute.xlu0 %3003 }
 0x870   :  { %v3006_v12 = vunpack.i.h.bf16 %v3004_v11  ;;  %v3005_v13 = vunpack.i.l.bf16 %v3004_v11  ;;  %v2199_v11 = vld [vmem:[%s4017_s16 + $0x18] sm:$0xff] }
 0x872   :  { %v2914_v14 = vpack.c.bf16 %v3006_v12, %v3005_v13  ;;  %v1448_v16 = vpop.xlane.xlu1 %1447  ;;  %v2930_v12 = vpack.c.bf16 %v2199_v11, %v2198_v8  ;;  %v2290_v13 = vld [vmem:[%s4019_s18] sm:$0xff]  ;;  %v2565_v11 = vld [vmem:[#allocation22] ss:$0 sm:$0xff] }
 0x874   :  { %2915 = vmatprep.subr.bf16.mxu1 %v2914_v14 }
 0x875   :  { %v3046_v17 = vpop.eup %3045  ;;  %2917 = vmatpush3.bf16.msra.mxu1 %v2914_v14  ;;  %v2291_v14 = vld [vmem:[%s4019_s18 + $0x8] sm:$0xff] }
 0x876   :  { %v3048_v18 = vpop.eup %3047  ;;  %v1454_v19 = vpop.xlane.xlu1 %1453  ;;  %v1466_v21 = vmul.f32 %v3046_v17, %v3030_v50 }
 0x877   :  { %v1465_v20 = vmul.f32 %v3048_v18, %v3032_v52 }
 0x879   :  { %2764 = vmatprep.mubr.msk.f32.mxu1 %vm1382_vm4, %v1465_v20 }
 0x87a   :  { %v1451_v22 = vpop.xlane.xlu1 %1450  ;;  %2765 = vmatmul.mubr.msk.f32.vlgmr.msra.gmra.mrb[12].mxu1 %vm1382_vm4, %v1466_v21 }
 0x87b   :  { %3049 = vrcp.f32 %v1451_v22 }
 0x87c   :  { %3051 = vrcp.f32 %v1454_v19 }
 0x87d   :  { %3053 = vrcp.f32 %v1448_v16  ;;  %v2934_v16 = vpack.c.bf16 %v2291_v14, %v2290_v13 }
 0x87e   :  { %v3009_v30 = vpop.permute.xlu1 %3008 }
 0x87f   :  { %v3011_v23 = vunpack.i.h.bf16 %v3009_v30  ;;  %v3010_v24 = vunpack.i.l.bf16 %v3009_v30 }
 0x881   :  { %v2918_v25 = vpack.c.bf16 %v3011_v23, %v3010_v24 }
 0x883   :  { %2919 = vmatprep.subr.bf16.mxu0 %v2918_v25 }
 0x884   :  { %2921 = vmatpush3.bf16.msra.mxu0 %v2918_v25 }
 0x885   :  { %v3050_v26 = vpop.eup %3049  ;;  %2781 = vmatprep.subr.mxu0 %v1796_v42 }
 0x886   :  { %v1469_v27 = vmul.f32 %v3050_v26, %v3038_v60  ;;  %v3052_v34 = vpop.eup %3051 }
 0x887   :  { %v3054_v35 = vpop.eup %3053  ;;  %v1470_v39 = vmul.f32 %v3052_v34, %v3874_v58 }
 0x888   :  { %2778 = vmatprep.mubr.msk.f32.mxu1 %vm1382_vm4, %v1469_v27  ;;  %v1468_v41 = vmul.f32 %v3054_v35, %v3870_v56 }
 0x8a0   :  { %v1445_v28 = vpop.xlane.xlu0 %1444 }
 0x8a1   :  { %3055 = vrcp.f32 %v1445_v28 }
 0x8a4   :  { %v3014_v29 = vpop.permute.xlu0 %3013 }
 0x8a5   :  { %v3016_v31 = vunpack.i.h.bf16 %v3014_v29  ;;  %v3015_v32 = vunpack.i.l.bf16 %v3014_v29 }
 0x8a7   :  { %v2922_v33 = vpack.c.bf16 %v3016_v31, %v3015_v32 }
 0x8a9   :  { %2923 = vmatprep.subr.bf16.mxu1 %v2922_v33 }
 0x8aa   :  { %2925 = vmatpush3.bf16.msra.mxu1 %v2922_v33  ;;  %v2557_v33 = vld [vmem:[#allocation19] ss:$0 sm:$0xff] }
 0x8ab   :  { %v3056_v38 = vpop.eup %3055 }
 0x8ac   :  { %v1467_v40 = vmul.f32 %v3056_v38, %v3044_v6  ;;  %v2196_v6 = vld [vmem:[%s4017_s16] sm:$0xff]  ;;  %v2558_v38 = vld [vmem:[#allocation20] ss:$0 sm:$0xff] }
 0x8ad   :  { %2779 = vmatmul.mubr.msk.f32.vlgmr.msra.gmra.mrb[14].mxu1 %vm1382_vm4, %v1470_v39  ;;  %v2926_v10 = vpack.c.bf16 %v2197_v7, %v2196_v6 }
 0x8ae   :  { %2771 = vmatprep.mubr.msk.f32.mxu0 %vm1382_vm4, %v1467_v40 }
 0x8af   :  { %2772 = vmatmul.mubr.msk.f32.vlgmr.msra.gmra.mrb[12].mxu0 %vm1382_vm4, %v1468_v41  ;;  %2927 = vmatprep.subr.bf16.mxu1 %v2926_v10 }
 0x8b0   :  { %2782 = vmatpush3.msra.mxu0 %v1796_v42  ;;  %2929 = vmatpush3.bf16.msra.mxu1 %v2926_v10 }
 0x8b1   :  { %2786 = vmatprep.subr.mxu0 %v1795_v43  ;;  %2931 = vmatprep.subr.bf16.mxu1 %v2930_v12 }
 0x8b4   :  { %2933 = vmatpush3.bf16.msra.mxu1 %v2930_v12 }
 0x8b5   :  { %2935 = vmatprep.subr.bf16.mxu1 %v2934_v16 }
 0x8d6   :  { %v2759_v44 = vpop.f32.mrb[10].mxu1 }
 0x8d7   :  { %v1543_v45 = vpop.f32.mrb[11].mxu1 }
 0x94d   :  { %v2766_v46 = vpop.f32.mrb[12].mxu1 }
 0x94e   :  { %v1624_v47 = vpop.f32.mrb[13].mxu1 }
 0x94f   :  { %2783 = vmatprep.mubr.msk.f32.mxu0 %vm262_vm6, %v1624_v47 }
 0x950   :  { %2784 = vmatmul.mubr.msk.f32.vlgmr.msra.gmra.mrb[14].mxu0 %vm262_vm6, %v2766_v46 }
 0x951   :  { %2788 = vmatprep.mubr.msk.f32.mxu0 %vm262_vm6, %v1543_v45  ;;  %2787 = vmatpush3.msra.mxu0 %v1795_v43  ;;  %v2292_v43 = vld [vmem:[%s4019_s18 + $0x10] sm:$0xff] }
 0x952   :  { %2791 = vmatprep.subr.mxu0 %v1797_v48 }
 0x958   :  { %2789 = vmatmul.mubr.msk.f32.vlgmr.msra.gmra.mrb[14].mxu0 %vm262_vm6, %v2759_v44  ;;  %v2293_v44 = vld [vmem:[%s4019_s18 + $0x18] sm:$0xff] }
 0x959   :  { %2792 = vmatpush3.msra.mxu0 %v1797_v48  ;;  %v2938_v47 = vpack.c.bf16 %v2293_v44, %v2292_v43  ;;  %v2294_v48 = vld [vmem:[%s4019_s18 + $0x20] sm:$0xff] }
 0x95a   :  { %2796 = vmatprep.subr.mxu0 %v1798_v49 }
 0x980   :  { %v2780_v50 = vpop.f32.mrb[14].mxu1 }
 0x981   :  { %v1786_v51 = vpop.f32.mrb[15].mxu1 }
 0x982   :  { %v2773_v52 = vpop.f32.mrb[12].mxu0 }
 0x983   :  { %v1705_v53 = vpop.f32.mrb[13].mxu0 }
 0x984   :  { %2793 = vmatprep.mubr.msk.f32.mxu0 %vm262_vm6, %v1705_v53 }
 0x985   :  { %2794 = vmatmul.mubr.msk.f32.vlgmr.msra.gmra.mrb[14].mxu0 %vm262_vm6, %v2773_v52  ;;  %v2297_v52 = vld [vmem:[%s4019_s18 + $0x38] sm:$0xff] }
 0x986   :  { %2797 = vmatpush3.msra.mxu0 %v1798_v49  ;;  %2798 = vmatprep.mubr.msk.f32.mxu0 %vm262_vm6, %v1786_v51  ;;  %v2295_v49 = vld [vmem:[%s4019_s18 + $0x28] sm:$0xff]  ;;  %v2296_v51 = vld [vmem:[%s4019_s18 + $0x30] sm:$0xff] }
 0x987   :  { %2950 = vmatprep.subr.bf16.mxu0 %v3406_v36  ;;  %v2946_v53 = vpack.c.bf16 %v2297_v52, %v2296_v51 }
 0x98d   :  { %2799 = vmatmul.mubr.msk.f32.vlgmr.msra.gmra.mrb[14].mxu0 %vm262_vm6, %v2780_v50  ;;  %v2942_v50 = vpack.c.bf16 %v2295_v49, %v2294_v48 }
 0x98e   :  { %2839 = vmatprep.mubr.msk.f32.mxu0 %vm3407_vm8, %v3408_v37 }
 0xa60   :  { %v2800_v54 = vpop.f32.mrb[14].mxu0 }
 0xa61   :  { %v2128_v56 = vadd.f32 %v2800_v54, %v3764_v15  ;;  %v2116_v57 = vpop.f32.mrb[15].mxu0  ;;  %v2559_v54 = vld [vmem:[#allocation16] ss:$0 sm:$0xff] }
 0xa62   :  { %v2127_v58 = vadd.f32 %v2116_v57, %v3759_v9 }
 0xa63   :  { %v3922_v59 = vadd.f32 %v2556_v55, %v2128_v56 }
 0xa64   :  { %v3924_v60 = vadd.f32 %v2556_v55, %v2127_v58 }
 0xa65   :  { %v2143_v61 = vsel %vm662_vm14, %v3922_v59, 0.0 }
 0xa66   :  { %2144 = vadd.xlane.f32.xlu1 %v2143_v61  ;;  %v2140_v62 = vsel %vm662_vm14, %v3924_v60, 0.0 }
 0xa67   :  { %2141 = vadd.xlane.f32.xlu0 %v2140_v62 }
 0xaf3   :  { %v2145_v37 = vpop.xlane.xlu1 %2144 }
 0xaf4   :  { %v2147_v63 = vmul.f32 0.03125, %v2145_v37  ;;  %v2142_v0 = vpop.xlane.xlu0 %2141  ;;  %v2393_v37 = vld [vmem:[%s4059_s13] sm:$0xff] }
 0xaf5   :  { %v2146_v1 = vmul.f32 0.03125, %v2142_v0 }
 0xaf6   :  { %v2149_v15 = vsub.f32 %v3922_v59, %v2147_v63  ;;  %v2394_v63 = vld [vmem:[%s4059_s13 + $0x8] sm:$0xff] }
 0xaf7   :  { %v2148_v9 = vsub.f32 %v3924_v60, %v2146_v1  ;;  %v2951_v0 = vpack.c.bf16 %v2394_v63, %v2393_v37  ;;  %v2395_v1 = vld [vmem:[%s4059_s13 + $0x10] sm:$0xff] }
 0xaf8   :  { %v2151_v4 = vmul.f32 %v2149_v15, %v2149_v15  ;;  %v2167_v40 = vmul.f32 %v2557_v33, %v2149_v15  ;;  %v2396_v15 = vld [vmem:[%s4059_s13 + $0x18] sm:$0xff] }
 0xaf9   :  { %v2150_v2 = vmul.f32 %v2148_v9, %v2148_v9  ;;  %v2166_v34 = vmul.f32 %v2557_v33, %v2148_v9  ;;  %2952 = vmatpush3.bf16.msra.mxu0 %v2951_v0  ;;  %v2954_v9 = vpack.c.bf16 %v2396_v15, %v2395_v1 }
 0xafa   :  { %v2155_v5 = vsel %vm662_vm14, %v2151_v4, 0.0  ;;  %2953 = vmatprep.subr.bf16.mxu0 %v3406_v36 }
 0xafb   :  { %v2152_v3 = vsel %vm662_vm14, %v2150_v2, 0.0  ;;  %v2562_v2 = vld [vmem:[#allocation17] ss:$0 sm:$0xff] }
 0xafc   :  { %2153 = vadd.xlane.f32.xlu0 %v2152_v3 }
 0xafd   :  { %2955 = vmatpush3.bf16.msra.mxu0 %v2954_v9 }
 0xb00   :  { %2156 = vadd.xlane.f32.xlu0 %v2155_v5 }
 0xb89   :  { %v2154_v17 = vpop.xlane.xlu0 %2153 }
 0xb8a   :  { %v2158_v18 = vmul.f32 0.032258064, %v2154_v17 }
 0xb8c   :  { %3057 = vrsqrt.f32 %v2158_v18  ;;  %vm2170_vm5 = vcmp.eq.f32.partialorder %v2158_v18, inf  ;;  %v2173_v30 = vand.u32 2147483648, %v2158_v18  ;;  %vm2172_vm6 = vcmp.eq.f32.partialorder %v2158_v18, 0.0 }
 0xb8d   :  { %v2157_v19 = vpop.xlane.xlu0 %2156 }
 0xb8e   :  { %v2159_v20 = vmul.f32 0.032258064, %v2157_v19 }
 0xb90   :  { %3059 = vrsqrt.f32 %v2159_v20  ;;  %vm2177_vm7 = vcmp.eq.f32.partialorder %v2159_v20, inf  ;;  %v2180_v28 = vand.u32 2147483648, %v2159_v20  ;;  %vm2179_vm8 = vcmp.eq.f32.partialorder %v2159_v20, 0.0 }
 0xb96   :  { %v3058_v21 = vpop.eup %3057 }
 0xb97   :  { %v2169_v22 = vmul.f32 %v3058_v21, %v2158_v18 }
 0xb99   :  { %v2171_v23 = vsel %vm2170_vm5, %v2158_v18, %v2169_v22 }
 0xb9a   :  { %v3060_v24 = vpop.eup %3059  ;;  %v2174_v25 = vsel %vm2172_vm6, %v2173_v30, %v2171_v23 }
 0xb9b   :  { %v2176_v26 = vmul.f32 %v3060_v24, %v2159_v20  ;;  %v2182_v27 = vadd.f32 1e-06, %v2174_v25 }
 0xb9d   :  { %v2178_v29 = vsel %vm2177_vm7, %v2159_v20, %v2176_v26  ;;  %3061 = vrcp.f32 %v2182_v27 }
 0xb9e   :  { %v2181_v31 = vsel %vm2179_vm8, %v2180_v28, %v2178_v29 }
 0xb9f   :  { %v2183_v32 = vadd.f32 1e-06, %v2181_v31 }
 0xba1   :  { %3063 = vrcp.f32 %v2183_v32 }
 0xba7   :  { %v3062_v35 = vpop.eup %3061 }
 0xba8   :  { %v2185_v39 = vmul.f32 %v3062_v35, %v2166_v34 }
 0xbaa   :  { %v2194_v41 = vadd.f32 %v2558_v38, %v2185_v39 }
 0xbab   :  { %v3064_v42 = vpop.eup %3063 }
 0xbac   :  { %v2187_v45 = vmul.f32 %v3064_v42, %v2167_v40  ;;  %2809 = vmatprep.mubr.msk.f32.mxu1 %vm662_vm14, %v2194_v41 }
 0xbae   :  { %v2195_v46 = vadd.f32 %v2558_v38, %v2187_v45 }
 0xbb0   :  { %2810 = vmatmul.mubr.msk.f32.vlgmr.msra.gmra.mrb[16].mxu1 %vm662_vm14, %v2195_v46 }
 0xbb1   :  { %2937 = vmatpush3.bf16.msra.mxu1 %v2934_v16 }
 0xbb2   :  { %2939 = vmatprep.subr.bf16.mxu1 %v2938_v47 }
 0xbb5   :  { %2941 = vmatpush3.bf16.msra.mxu1 %v2938_v47 }
 0xbb6   :  { %2943 = vmatprep.subr.bf16.mxu1 %v2942_v50 }
 0xbb9   :  { %2945 = vmatpush3.bf16.msra.mxu1 %v2942_v50 }
 0xbba   :  { %2947 = vmatprep.subr.bf16.mxu1 %v2946_v53 }
 0xbbd   :  { %2949 = vmatpush3.bf16.msra.mxu1 %v2946_v53 }
 0xc83   :  { %v2811_v55 = vpop.f32.mrb[16].mxu1 }
 0xc84   :  { %v2285_v56 = vadd.f32 %v2811_v55, %v2559_v54  ;;  %v2279_v57 = vpop.f32.mrb[17].mxu1 }
 0xc85   :  { %v2280_v58 = vadd.f32 %v2559_v54, %v2279_v57 }
 0xc86   :  { %v2289_v62 = vmax.f32 %v2285_v56, 0.0 }
 0xc87   :  { %v2288_v61 = vmax.f32 %v2280_v58, 0.0 }
 0xc89   :  { %2828 = vmatprep.mubr.msk.f32.mxu1 %vm2305_vm9, %v2288_v61 }
 0xc8a   :  { %2829 = vmatmul.mubr.msk.f32.vlgmr.msra.gmra.mrb[18].mxu1 %vm2305_vm9, %v2289_v62 }
 0xd5d   :  { %v2830_v3 = vpop.f32.mrb[18].mxu1 }
 0xd5e   :  { %v2384_v4 = vadd.f32 %v2830_v3, %v2562_v2  ;;  %v2378_v5 = vpop.f32.mrb[19].mxu1 }
 0xd5f   :  { %v2379_v6 = vadd.f32 %v2562_v2, %v2378_v5 }
 0xd60   :  { %v2388_v7 = vadd.f32 %v2384_v4, %v3922_v59 }
 0xd61   :  { %v2387_v8 = vadd.f32 %v2379_v6, %v3924_v60 }
 0xd62   :  { %v2390_v36 = vrot.slane %v2388_v7, 7 }
 0xd64   :  { %v2392_v10 = vsel %vm455_vm13, %v2387_v8, %v2390_v36 }
 0xd65   :  { %2840 = vmatmul.mubr.msk.f32.vlgmr.msra.gmra.mrb[16].mxu0 %vm662_vm14, %v2392_v10 }
 0xe38   :  { %v2473_v12 = vpop.f32.mrb[16].mxu0 }
 0xe39   :  { %v2474_v13 = vadd.f32 %v2565_v11, %v2473_v12  ;;  %v2841_v14 = vpop.f32.mrb[17].mxu0 }
 0xe3b   :  { %2478 = vst.msk [vmem:[#allocation23] sm:$0x3] %vm2477_vm10, %v2474_v13 }
 0xe3c   :  { %3362 = shalt.err (!%p3359_p10)
}
 0xe3d   :  { %s4060_s21 = sld [smem:[#allocation42_spill]] }
 0xe43   :  { %s3363_s17 = scalar_lea.hbm %s4060_s21, 32 }
 0xe44   :  { %p3364_p11 = scmp.ne.s32.totalorder %s4060_s21, %s3363_s17  ;;  %p3367_p12 = scmp.lt.u32.totalorder %s3363_s17, %s4060_s21 }
 0xe46   :  { %p3369_p13 = pnand %p3367_p12, %p3364_p11 }
 0xe48   :  { %3372 = shalt.err (!%p3369_p13)
}
 0xe49   :  { %2488 = dma.vmem_to_hbm [thread:$0]  %s2486_s0, 32, %s4060_s21, [#allocation4]  }
 0xe4a   :  { %3387 = dma.done.wait [#allocation4], 32  }
 0xe4b   :  { %3388 = vsyncadd [#allocation4], 4294967264 }
 0xe4c   :  { %2492 = vsyncpa [#allocation3], 1 }
 0xe4d   :  { %2493 = vsyncpa [#allocation6], 1 }
 0xe4e   :  { %2494 = vsyncpa [#allocation9], 1 }
 0xe4f   :  { %2495 = vsyncpa [#allocation12], 1 }
 0xe50   :  { %2496 = vsyncpa [#allocation15], 1 }
 0xe51   :  { %2497 = vsyncpa [#allocation18], 1 }
 0xe52   :  { %2498 = vsyncpa [#allocation21], 1 }
 0xe53   :  { %2499 = vsyncpa [#allocation4], 1 }

</bundles_post_ra>
